<compile_context>
chip_gen: v6e
topology: v6e:2x2x1
jax: 0.10.0
libtpu: 0.0.40
codegen_flags: <defaults>
</compile_context>

<pallas_src>
import jax
import jax.numpy as jnp
from jax.experimental import pallas as pl
from jax.experimental.pallas import tpu as pltpu


def discriminator_kernel(x_ref, w1_ref, b1_ref, w2_ref, b2_ref, out_ref):
    # Hidden affine + tanh: MXU matmul (f32 accumulate), VPU add, EUP tanh.
    x = x_ref[...]                                              # (bt, D)
    h = jnp.tanh(
        jnp.dot(x, w1_ref[...], preferred_element_type=jnp.float32)
        + b1_ref[...]
    )                                                           # (bt, H) f32
    # Logic head (out_features == 1): broadcast-multiply by the (1, H) weight
    # row + lane reduce on the VPU/XLU instead of a width-1 MXU matmul.
    logit = jnp.sum(h * w2_ref[...], axis=-1) + b2_ref[0]       # (bt,)
    # Lane-dense store: batch maps to the 128-lane axis of the output slab.
    out_ref[...] = jax.nn.sigmoid(logit)[None, :]               # (1, bt)


def _round_up(v, m):
    return ((v + m - 1) // m) * m


def discriminator_forward(x, w1, b1, w2, b2, *, max_batch_tile=2048,
                          use_bf16_mxu=False):
    """prob = sigmoid(tanh(x @ w1 + b1) @ w2.T + b2), returned as (B, 1)."""
    B, D = x.shape
    H = w1.shape[1]
    assert w1.shape == (D, H)
    assert b1.shape == (1, H)
    assert w2.shape == (1, H)
    assert b2.shape == (1,)

    # Cover the batch in ~2 grid steps (even count -> v7x megacore can split
    # the "parallel" axis across both TCs; on v5e/v6e it's just minimal
    # sequential step overhead while keeping DMA/compute overlap).  Tile is
    # lane-aligned (multiple of 128) because batch maps to the output lanes.
    bt = max(128, min(max_batch_tile, _round_up(pl.cdiv(B, 2), 128)))
    num_tiles = pl.cdiv(B, bt)  # ragged last tile handled by clamped DMAs

    if use_bf16_mxu:
        # Opt-in: halves streamed x bytes and feeds the bf16-native MXU on
        # v6e/v7x.  Accumulation and tanh/sigmoid stay in f32.
        x_in = x.astype(jnp.bfloat16)
        w1_in = w1.astype(jnp.bfloat16)
    else:
        x_in, w1_in = x, w1

    cost = pl.CostEstimate(
        flops=2 * B * D * H + 2 * B * H,
        transcendentals=B * H + B,
        bytes_accessed=(x_in.size * x_in.dtype.itemsize
                        + w1_in.size * w1_in.dtype.itemsize
                        + (2 * H + 1 + B) * 4),
    )

    out = pl.pallas_call(
        discriminator_kernel,
        out_shape=jax.ShapeDtypeStruct((1, B), jnp.float32),
        grid_spec=pltpu.PrefetchScalarGridSpec(
            num_scalar_prefetch=0,
            grid=(num_tiles,),
            in_specs=[
                pl.BlockSpec((bt, D), lambda i: (i, 0)),   # x tile (streamed)
                pl.BlockSpec((D, H), lambda i: (0, 0)),    # W1 (in,out), resident
                pl.BlockSpec((1, H), lambda i: (0, 0)),    # b1, resident
                pl.BlockSpec((1, H), lambda i: (0, 0)),    # w2 row, resident
                pl.BlockSpec(memory_space=pltpu.SMEM),     # b2 scalar in SMEM
            ],
            out_specs=pl.BlockSpec((1, bt), lambda i: (0, i)),  # lane-dense
        ),
        compiler_params=pltpu.CompilerParams(
            dimension_semantics=("parallel",)
        ),
        cost_estimate=cost,
    )(x_in, w1_in, b1, w2, b2)

    # Wrapper-side layout plumbing back to the PyTorch (B, 1) shape.
    return out.reshape(B, 1)


def init_params(key, hidden=128):
    """Deterministic init mimicking nn.Linear default (U(-1/sqrt(in), 1/sqrt(in)))."""
    k1, k2, k3 = jax.random.split(key, 3)
    bound_h = 1.0 / jnp.sqrt(jnp.float32(hidden))
    # affine_layers[0]: Linear(hidden, hidden); stored transposed as (in, out).
    w1 = jax.random.uniform(k1, (hidden, hidden), jnp.float32, -bound_h, bound_h)
    b1 = jax.random.uniform(k2, (1, hidden), jnp.float32, -bound_h, bound_h)
    # logic: Linear(hidden, 1); weight kept in PyTorch (out=1, in=hidden) row
    # layout, scaled by 0.1; bias zeroed, per the module's __init__.
    w2 = 0.1 * jax.random.uniform(k3, (1, hidden), jnp.float32, -bound_h, bound_h)
    b2 = jnp.zeros((1,), jnp.float32)
    return w1, b1, w2, b2


if __name__ == "__main__":
    key = jax.random.PRNGKey(0)
    kx, kp = jax.random.split(key)

    # forward() consumes x of shape (batch, hidden_size[0]); hidden is fixed
    # at 128 by the module.  B=384 exercises the 2-tile grid with a ragged
    # last tile (no jnp.pad copy of x).
    B, HIDDEN = 384, 128
    x = jax.random.normal(kx, (B, HIDDEN), jnp.float32)
    w1, b1, w2, b2 = init_params(kp, HIDDEN)

    prob = discriminator_forward(x, w1, b1, w2, b2)
    prob = jax.block_until_ready(prob)

    # Pure-JAX reference for sanity.
    ref = jax.nn.sigmoid(jnp.tanh(x @ w1 + b1) @ w2.T + b2)
    assert prob.shape == (B, 1)
    assert jnp.allclose(prob, ref, atol=1e-5, rtol=1e-5)

    print("KERNEL_OK")
</pallas_src>

<mosaic_0001>
module attributes {stable_mosaic.version = 11 : i64} {
  func.func @discriminator_kernel(%arg0: i32, %arg1: memref<256x128xf32, #tpu.memory_space<vmem>>, %arg2: memref<128x128xf32, #tpu.memory_space<vmem>>, %arg3: memref<1x128xf32, #tpu.memory_space<vmem>>, %arg4: memref<1x128xf32, #tpu.memory_space<vmem>>, %arg5: memref<1xf32, #tpu.memory_space<smem>>, %arg6: memref<1x256xf32, #tpu.memory_space<vmem>>) attributes {dimension_semantics = [#tpu.dimension_semantics<parallel>], iteration_bounds = array<i64: 2>, scalar_prefetch = 0 : i64, scratch_operands = 0 : i64, tpu.core_type = #tpu.core_type<tc>, window_params = [{transform_indices = @transform_0, window_bounds = array<i64: 256, 128>}, {pipeline_mode = #tpu.pipeline_mode<synchronous>, transform_indices = @transform_1, window_bounds = array<i64: 128, 128>}, {pipeline_mode = #tpu.pipeline_mode<synchronous>, transform_indices = @transform_2, window_bounds = array<i64: 1, 128>}, {pipeline_mode = #tpu.pipeline_mode<synchronous>, transform_indices = @transform_3, window_bounds = array<i64: 1, 128>}, {transform_indices = @transform_4, window_bounds = array<i64: 1>}, {transform_indices = @transform_5, window_bounds = array<i64: 1, 256>}]} {
    %c0 = arith.constant 0 : index
    %c0_0 = arith.constant 0 : index
    %0 = vector.load %arg1[%c0, %c0_0] : memref<256x128xf32, #tpu.memory_space<vmem>>, vector<256x128xf32>
    %c0_1 = arith.constant 0 : index
    %c0_2 = arith.constant 0 : index
    %1 = vector.load %arg2[%c0_1, %c0_2] : memref<128x128xf32, #tpu.memory_space<vmem>>, vector<128x128xf32>
    %cst = arith.constant dense<0.000000e+00> : vector<256x128xf32>
    %2 = tpu.matmul %0, %1, %cst {dimension_numbers = #tpu.dot_dimension_numbers<[1], [0], [0], [1], [0, 0, 1, 1], [], []>} : vector<256x128xf32>, vector<128x128xf32>, vector<256x128xf32> -> vector<256x128xf32>
    %c0_3 = arith.constant 0 : index
    %c0_4 = arith.constant 0 : index
    %3 = vector.load %arg3[%c0_3, %c0_4] : memref<1x128xf32, #tpu.memory_space<vmem>>, vector<1x128xf32>
    %4 = vector.broadcast %3 : vector<1x128xf32> to vector<256x128xf32>
    %5 = arith.addf %2, %4 : vector<256x128xf32>
    %6 = math.tanh %5 : vector<256x128xf32>
    %c0_5 = arith.constant 0 : index
    %c0_6 = arith.constant 0 : index
    %7 = vector.load %arg4[%c0_5, %c0_6] : memref<1x128xf32, #tpu.memory_space<vmem>>, vector<1x128xf32>
    %8 = vector.broadcast %7 : vector<1x128xf32> to vector<256x128xf32>
    %9 = arith.mulf %6, %8 : vector<256x128xf32>
    %cst_7 = arith.constant dense<0.000000e+00> : vector<256xf32>
    %10 = vector.multi_reduction <add>, %9, %cst_7 [1] : vector<256x128xf32> to vector<256xf32>
    %c0_8 = arith.constant 0 : index
    %11 = memref.load %arg5[%c0_8] : memref<1xf32, #tpu.memory_space<smem>>
    %12 = vector.broadcast %11 : f32 to vector<256xf32>
    %13 = arith.addf %10, %12 : vector<256xf32>
    %14 = arith.negf %13 : vector<256xf32>
    %15 = math.exp %14 : vector<256xf32>
    %cst_9 = arith.constant 1.000000e+00 : f32
    %16 = vector.broadcast %cst_9 : f32 to vector<256xf32>
    %17 = arith.addf %16, %15 : vector<256xf32>
    %18 = arith.divf %16, %17 : vector<256xf32>
    %19 = vector.shape_cast %18 : vector<256xf32> to vector<1x256xf32>
    %c0_10 = arith.constant 0 : index
    %c0_11 = arith.constant 0 : index
    %20 = vector.load %arg6[%c0_10, %c0_11] : memref<1x256xf32, #tpu.memory_space<vmem>>, vector<1x256xf32>
    tpu.vector_store %arg6[%c0_10, %c0_11], %19 {strides = array<i32>} : memref<1x256xf32, #tpu.memory_space<vmem>>, vector<1x256xf32>,
    return
  }
  func.func @transform_0(%arg0: i32) -> (i32, i32) {
    %c0_i32 = arith.constant 0 : i32
    %c0_i32_0 = arith.constant 0 : i32
    return %arg0, %c0_i32 : i32, i32
  }
  func.func @transform_1(%arg0: i32) -> (i32, i32) {
    %c0_i32 = arith.constant 0 : i32
    %c0_i32_0 = arith.constant 0 : i32
    %c0_i32_1 = arith.constant 0 : i32
    return %c0_i32, %c0_i32_0 : i32, i32
  }
  func.func @transform_2(%arg0: i32) -> (i32, i32) {
    %c0_i32 = arith.constant 0 : i32
    %c0_i32_0 = arith.constant 0 : i32
    %c0_i32_1 = arith.constant 0 : i32
    return %c0_i32, %c0_i32_0 : i32, i32
  }
  func.func @transform_3(%arg0: i32) -> (i32, i32) {
    %c0_i32 = arith.constant 0 : i32
    %c0_i32_0 = arith.constant 0 : i32
    %c0_i32_1 = arith.constant 0 : i32
    return %c0_i32, %c0_i32_0 : i32, i32
  }
  func.func @transform_4(%arg0: i32) -> i32 {
    %c0_i32 = arith.constant 0 : i32
    %c0_i32_0 = arith.constant 0 : i32
    return %c0_i32 : i32
  }
  func.func @transform_5(%arg0: i32) -> (i32, i32) {
    %c0_i32 = arith.constant 0 : i32
    %c0_i32_0 = arith.constant 0 : i32
    return %c0_i32, %arg0 : i32, i32
  }
}

</mosaic_0001>

<bundles_post_ra>
// kernel: tpu_custom_call.1
= control target key start
LH: loop header
LB: loop body
LE: loop exit
PB: predicated region body
PF: predicated region fallthrough
CT: control target
= control target key end

     0   :  { %s5794_s0 = inlined_call_operand.hbm [shape: f32[384,128], index: 0, kind: input, shape index: {}]   ;;  %s5795_s1 = inlined_call_operand.hbm [shape: f32[128,128], index: 1, kind: input, shape index: {}]   ;;  %s5796_s2 = inlined_call_operand.vmem [shape: f32[1,128], index: 2, kind: input, shape index: {}]   ;;  %s5797_s3 = inlined_call_operand.vmem [shape: f32[1,128], index: 3, kind: input, shape index: {}]   ;;  %s5798_s4 = inlined_call_operand.<no memory space> [shape: f32[1], index: 4, kind: input, shape index: {}]   ;;  %s5799_s5 = inlined_call_operand.hbm [shape: f32[1,384], index: 5, kind: output, shape index: {}]  }
   0x1   :  { %10 = sst [smem:[#allocation2]] %s5798_s4 }
   0x2   :  { %11 = vsyncpa [#allocation4], 0 }
   0x3   :  { %13 = vsyncpa [#allocation4 + $0x1], 0 }
   0x4   :  { %14 = vsyncpa [#allocation7], 0 }
   0x5   :  { %15 = vsyncpa [#allocation5], 0 }
   0x6   :  { %17 = vsyncpa [#allocation5 + $0x1], 0  ;;  %s4579_s20 = smov 0   ;;  %s4581_s21 = smov 0  }
   0x7   :  { %s4583_s22 = smov 0   ;;  %s4585_s23 = smov 0  }
   0x8 LB: > { %s4600_s4 = sadd.s32 4294967295, %s4535_s23   ;;  %s3947_s24 = sadd.s32 4294967294, %s4535_s23   ;;  %s4535_s23 = sphi %s4585_s23, %s5814_s23   ;;  %s4531_s22 = sphi %s4583_s22, %s5813_s22   ;;  %s4527_s21 = sphi %s4581_s21, %s5812_s21   ;;  %s4523_s20 = sphi %s4579_s20, %s5811_s20  }
   0x9   : > { %s4604_s25 = sadd.s32 1, %s4535_s23   ;;  %s30_s26 = sadd.s32 1, %s4531_s22 }
   0xa   : > { %s27_s27 = ssub.s32 %s4535_s23, %s4604_s25  ;;  %p37_p0 = scmp.ne.s32.totalorder %s4531_s22, %s4527_s21 }
   0xb   : > { %p28_p1 = scmp.eq.s32.totalorder %s27_s27, 0  ;;  %p38_p2 = scmp.eq.s32.totalorder %s4535_s23, 0 }
   0xc   : > { %p43_p3 = scmp.ne.s32.totalorder %s4527_s21, %s4523_s20  ;;  %p44_p4 = scmp.eq.s32.totalorder %s4600_s4, 0 }
   0xd   : > { %s4616_s28 = scalar_select %p28_p1, %s4531_s22, %s30_s26  }
   0xe   : > { %p4618_p5 = por %p38_p2, %p37_p0  ;;  %p4624_p6 = por %p44_p4, %p43_p3 }
   0xf   : > { %p151_p7 = scmp.eq.s32.totalorder %s4600_s4, 1  ;;  %p157_p8 = scmp.eq.s32.totalorder %s3947_s24, 1 }
  0x10   : > { %s5803_s30 = scalar_select %p4624_p6, 1, 0 }
  0x11   : > { %p3948_p9 = scmp.ge.s32.totalorder %s4535_s23, 1  ;;  %p164_p10 = scmp.lt.s32.totalorder %s4535_s23, 3 }
  0x12   : > { %p4631_p11 = por %p151_p7, %p37_p0  ;;  %p4635_p12 = por %p157_p8, %p43_p3 }
  0x13   : > { %p4639_p13 = pnand %p3948_p9, %p164_p10  ;;  %s4537_s9 = smov [#allocation6]  }
  0x14   : > { %s5804_s6 = scalar_select %p4631_p11, 1, 0 }
  0x15   : > { %s5805_s7 = scalar_select %p4635_p12, 1, 0 }
  0x16   : > { %p4171_p1 = pneg %p4639_p13  ;;  %s176_s10 = sshll.u32 %s4537_s9, 4  ;;  %s177_s10 = int_to_ptr.vmem [resolvable:$true] %s176_s10 }
  0x17   : > { %s4426_s11 = scalar_lea.vmem %s177_s10, 2048  ;;  %p4434_p8 = scmp.lt.s32.totalorder %s177_s10, %s177_s10 }
  0x18   : > { %p4172_p2 = pnand %p4171_p1, %p44_p4  ;;  %p4427_p7 = scmp.ne.s32.totalorder %s177_s10, %s4426_s11 }
  0x19   : > { %p4435_p6 = scmp.lt.s32.totalorder %s4426_s11, %s4426_s11 }
  0x1a   : > { %p4417_p0 = pneg %p4172_p2 }
  0x1b   : > { %p4436_p12 = por %p4435_p6, %p4434_p8 }
  0x1c   : > { %p4429_p11 = pnand %p4427_p7, %p4417_p0 }
  0x1e   : > { %p4430_p3 = pneg %p4429_p11 }
  0x20   : > { %p4437_p9 = pnand %p4436_p12, %p4430_p3 }
  0x22   : > { %4440 = shalt.err (!%p4437_p9)
}
  0x23   : > { %s4538_s12 = smov 128   ;;  %s4539_s13 = smov 8  }
  0x24   : > { %4174 = dma.hbm_to_vmem [thread:$0]  (!%p4172_p2), %s5795_s1, 2048, %s177_s10, [#allocation7], %s4538_s12, %s4538_s12, %s4539_s13  }
  0x25   : > { %p5801_p10 = scmp.ge.s32.totalorder %s4535_s23, 2 }
  0x27   : > { %195 = sbr.rel (%p5801_p10) target bundleno = 76 (0x4c), region = 32 }
  0x2c   : > { %198 = sbr.rel (!%p4618_p5) target bundleno = 76 (0x4c), region = 36  ;;  %s199_s16 = sand.u32 (%p4618_p5), 1, %s4531_s22  }
  0x2d   : > { %s3952_s17 = sshll.u32 (%p4618_p5), %s4535_s23, 5  ;;  %s3951_s18 = sshll.u32 (%p4618_p5), %s199_s16, 8 }
  0x2e   : > { %s205_s19 = ssub.s32 (%p4618_p5), 48, %s3952_s17  ;;  %s4660_s27 = scalar_lea.sflag (%p4618_p5), [#allocation4], %s199_s16 }
  0x2f   : > { %p206_p6 = scmp.lt.s32.totalorder (%p4618_p5), %s205_s19, 32  ;;  %s203_s9 = scalar_lea.vmem (%p4618_p5), [#allocation3], %s3951_s18 }
  0x31   : > { %s5816_s19 = smov (!%p206_p6, %s205_s19), 32 }
  0x32   : > { %s4657_s24 = sshll.u32 %s5816_s19, 7 }
  0x33   : > { %s210_s26 = ssub.s32 4096, %s4657_s24 }
  0x34   : > { %211 = vsyncadd %s4660_s27, %s210_s26  ;;  %p3954_p5 = scmp.ne.s32.totalorder %s4657_s24, 0  ;;  %s4003_s29 = sshll.u32 %s4535_s23, 12 }
  0x35   : > { %s4668_s12 = scalar_lea.hbm %s5794_s0, %s4003_s29  ;;  %s216_s13 = sshll.u32 %s203_s9, 4  ;;  %s4670_s13 = int_to_ptr.vmem [resolvable:$true] %s216_s13 }
  0x36   : > { %s4441_s14 = scalar_lea.hbm %s4668_s12, %s4657_s24  ;;  %s4445_s17 = scalar_lea.hbm %s5794_s0, 6144 }
  0x37   : > { %p4442_p11 = scmp.ne.s32.totalorder %s4668_s12, %s4441_s14  ;;  %p4446_p2 = scmp.lt.s32.totalorder %s4668_s12, %s5794_s0 }
  0x38   : > { %p4447_p0 = scmp.lt.s32.totalorder %s4445_s17, %s4441_s14 }
  0x39   : > { %p4443_p12 = pnand %p4442_p11, %p3954_p5 }
  0x3a   : > { %p4448_p7 = por %p4447_p0, %p4446_p2 }
  0x3b   : > { %p4444_p1 = pneg %p4443_p12 }
  0x3d   : > { %p4449_p3 = pnand %p4448_p7, %p4444_p1 }
  0x3f   : > { %4452 = shalt.err (!%p4449_p3)
}
  0x40   : > { %s4453_s26 = scalar_lea.vmem %s4670_s13, %s4657_s24  ;;  %s4540_s9 = smov [#allocation3]  }
  0x41   : > { %p4454_p8 = scmp.ne.s32.totalorder %s4670_s13, %s4453_s26  ;;  %s4457_s29 = sshll.u32 %s4540_s9, 4  ;;  %s4458_s29 = int_to_ptr.vmem [resolvable:$false] %s4457_s29 }
  0x42   : > { %s4459_s10 = scalar_lea.vmem %s4458_s29, 8192  ;;  %p4460_p11 = scmp.lt.s32.totalorder %s4670_s13, %s4458_s29 }
  0x43   : > { %p4455_p9 = pnand %p4454_p8, %p3954_p5  ;;  %p4461_p12 = scmp.lt.s32.totalorder %s4459_s10, %s4453_s26 }
  0x45   : > { %p4456_p6 = pneg %p4455_p9  ;;  %p4462_p10 = por %p4461_p12, %p4460_p11 }
  0x47   : > { %p4463_p2 = pnand %p4462_p10, %p4456_p6 }
  0x49   : > { %4466 = shalt.err (!%p4463_p2)
}
  0x4a   : > { %s4541_s11 = smov 128   ;;  %s4542_s14 = smov 8  }
  0x4b   : > { %222 = dma.hbm_to_vmem [thread:$0]  (%p3954_p5), %s4668_s12, %s4657_s24, %s4670_s13, %s4660_s27, %s4541_s11, %s4541_s11, %s4542_s14  }
  0x4c PF: > { %228 = sbr.rel (%p4639_p13) target bundleno = 860 (0x35c), region = 40  ;;  %s4699_s15 = sand.u32 (!%p4639_p13), 1, %s4527_s21  }
  0x4d   : > { %s3959_s16 = sshll.u32 (!%p4639_p13), %s4699_s15, 8  ;;  %s231_s17 = scalar_lea.sflag (!%p4639_p13), [#allocation4], %s4699_s15 }
  0x4e   : > { %s4703_s18 = scalar_lea.vmem (!%p4639_p13), [#allocation3], %s3959_s16  ;;  %p5807_p10 = scmp.ne.s32.totalorder (!%p4639_p13), %s5803_s30, 0 }
  0x51   : > { %4510 = dma.done.wait (%p5807_p10), %s231_s17, 4096  }
  0x52   : > { %4512 = vsyncadd (%p5807_p10), %s231_s17, 4294963200 }
  0x53   : > { %4514 = dma.done.wait (%p44_p4), [#allocation7], 2048  }
  0x54   : > { %4516 = vsyncadd (%p44_p4), [#allocation7], 4294965248  ;;  %v322_v0 = vld [vmem:[#allocation6 + $0x78] sm:$0xff]  ;;  %v321_v1 = vld [vmem:[#allocation6 + $0x70] sm:$0xff]  ;;  %s690_s12 = sld [smem:[#allocation2]]  ;;  %vm3647_vm0 = vcmask 130112  }
  0x55   : > { %4053 = vmatprep.subr.mxu0 %v322_v0  ;;  %4133 = vmatprep.subr.mxu1 %v322_v0  ;;  %v320_v2 = vld [vmem:[#allocation6 + $0x68] sm:$0xff]  ;;  %v319_v3 = vld [vmem:[#allocation6 + $0x60] sm:$0xff]  ;;  %v318_v4 = vld [vmem:[#allocation6 + $0x58] sm:$0xff]  ;;  %vm3654_vm1 = vcmask 195712   ;;  %vm3661_vm2 = vcmask 261312   ;;  %vm3668_vm3 = vcmask 326912  }
  0x56   : > { %4054 = vmatpush3.msra.mxu0 %v322_v0  ;;  %4149 = vmatpush3.msra.mxu1 %v322_v0  ;;  %v317_v5 = vld [vmem:[#allocation6 + $0x50] sm:$0xff]  ;;  %v316_v6 = vld [vmem:[#allocation6 + $0x48] sm:$0xff]  ;;  %v315_v7 = vld [vmem:[#allocation6 + $0x40] sm:$0xff]  ;;  %vm3675_vm4 = vcmask 392512   ;;  %vm3682_vm5 = vcmask 458112   ;;  %vm3689_vm6 = vcmask 523712  }
  0x57   : > { %4055 = vmatprep.subr.mxu0 %v321_v1  ;;  %4134 = vmatprep.subr.mxu1 %v321_v1  ;;  %v314_v8 = vld [vmem:[#allocation6 + $0x38] sm:$0xff]  ;;  %v313_v9 = vld [vmem:[#allocation6 + $0x30] sm:$0xff]  ;;  %v312_v10 = vld [vmem:[#allocation6 + $0x28] sm:$0xff]  ;;  %vm3696_vm7 = vcmask 589312   ;;  %vm3703_vm8 = vcmask 654912   ;;  %vm3710_vm9 = vcmask 720512  }
  0x58   : > { %4056 = vmatpush3.msra.mxu0 %v321_v1  ;;  %4150 = vmatpush3.msra.mxu1 %v321_v1  ;;  %v311_v11 = vld [vmem:[#allocation6 + $0x20] sm:$0xff]  ;;  %v310_v12 = vld [vmem:[#allocation6 + $0x18] sm:$0xff]  ;;  %v309_v13 = vld [vmem:[#allocation6 + $0x10] sm:$0xff]  ;;  %vm3717_vm10 = vcmask 786112   ;;  %vm3724_vm11 = vcmask 851712   ;;  %vm3731_vm12 = vcmask 917312  }
  0x59   : > { %4057 = vmatprep.subr.mxu0 %v320_v2  ;;  %4135 = vmatprep.subr.mxu1 %v320_v2  ;;  %v308_v14 = vld [vmem:[#allocation6 + $0x8] sm:$0xff]  ;;  %v307_v15 = vld [vmem:[#allocation6] sm:$0xff]  ;;  %v277_v20 = vld [vmem:[%s4703_s18 + $0x10] sm:$0xff]  ;;  %vm3738_vm13 = vcmask 982912   ;;  %vm3745_vm14 = vcmask 1048512   ;;  %s3961_s13 = sshll.u32 %s4699_s15, 1 }
  0x5a   : > { %4058 = vmatpush3.msra.mxu0 %v320_v2  ;;  %4151 = vmatpush3.msra.mxu1 %v320_v2  ;;  %v275_v16 = vld [vmem:[%s4703_s18] sm:$0xff]  ;;  %v276_v18 = vld [vmem:[%s4703_s18 + $0x8] sm:$0xff]  ;;  %v293_v21 = vld [vmem:[%s4703_s18 + $0x90] sm:$0xff]  ;;  %s264_s19 = scalar_lea.vmem [#allocation8], %s3961_s13  ;;  %s3848_s26 = scalar_lea.sflag [#allocation5], %s4699_s15 }
  0x5b   : > { %4059 = vmatprep.subr.mxu0 %v319_v3  ;;  %4136 = vmatprep.subr.mxu1 %v319_v3  ;;  %v291_v17 = vld [vmem:[%s4703_s18 + $0x80] sm:$0xff]  ;;  %v292_v19 = vld [vmem:[%s4703_s18 + $0x88] sm:$0xff]  ;;  %v278_v22 = vld [vmem:[%s4703_s18 + $0x18] sm:$0xff]  ;;  %p5808_p4 = scmp.ne.s32.totalorder %s5804_s6, 0 }
  0x5c   : > { %4060 = vmatpush3.msra.mxu0 %v319_v3  ;;  %4152 = vmatpush3.msra.mxu1 %v319_v3  ;;  %v294_v23 = vld [vmem:[%s4703_s18 + $0x98] sm:$0xff]  ;;  %v279_v24 = vld [vmem:[%s4703_s18 + $0x20] sm:$0xff]  ;;  %v280_v26 = vld [vmem:[%s4703_s18 + $0x28] sm:$0xff]  ;;  %s3997_s9 = sshll.u32 (%p5808_p4), %s4600_s4, 1 }
  0x5d   : > { %4061 = vmatprep.subr.mxu0 %v318_v4  ;;  %4137 = vmatprep.subr.mxu1 %v318_v4  ;;  %v295_v25 = vld [vmem:[%s4703_s18 + $0xa0] sm:$0xff]  ;;  %v296_v27 = vld [vmem:[%s4703_s18 + $0xa8] sm:$0xff]  ;;  %v281_v28 = vld [vmem:[%s4703_s18 + $0x30] sm:$0xff]  ;;  %s3856_s29 = ssub.s32 (%p5808_p4), 3, %s3997_s9 }
  0x5e   : > { %4062 = vmatpush3.msra.mxu0 %v318_v4  ;;  %4153 = vmatpush3.msra.mxu1 %v318_v4  ;;  %v297_v29 = vld [vmem:[%s4703_s18 + $0xb0] sm:$0xff]  ;;  %v282_v30 = vld [vmem:[%s4703_s18 + $0x38] sm:$0xff]  ;;  %v283_v32 = vld [vmem:[%s4703_s18 + $0x40] sm:$0xff]  ;;  %p3857_p13 = scmp.lt.s32.totalorder (%p5808_p4), %s3856_s29, 2 }
  0x5f   : > { %4063 = vmatprep.subr.mxu0 %v317_v5  ;;  %4138 = vmatprep.subr.mxu1 %v317_v5  ;;  %v298_v31 = vld [vmem:[%s4703_s18 + $0xb8] sm:$0xff]  ;;  %v299_v33 = vld [vmem:[%s4703_s18 + $0xc0] sm:$0xff]  ;;  %v284_v34 = vld [vmem:[%s4703_s18 + $0x48] sm:$0xff] }
  0x60   : > { %4064 = vmatpush3.msra.mxu0 %v317_v5  ;;  %4154 = vmatpush3.msra.mxu1 %v317_v5  ;;  %v300_v35 = vld [vmem:[%s4703_s18 + $0xc8] sm:$0xff]  ;;  %v301_v36 = vld [vmem:[%s4703_s18 + $0xd0] sm:$0xff]  ;;  %v302_v38 = vld [vmem:[%s4703_s18 + $0xd8] sm:$0xff] }
  0x61   : > { %4065 = vmatprep.subr.mxu0 %v316_v6  ;;  %4139 = vmatprep.subr.mxu1 %v316_v6  ;;  %v285_v37 = vld [vmem:[%s4703_s18 + $0x50] sm:$0xff]  ;;  %v286_v39 = vld [vmem:[%s4703_s18 + $0x58] sm:$0xff]  ;;  %v303_v40 = vld [vmem:[%s4703_s18 + $0xe0] sm:$0xff] }
  0x62   : > { %4066 = vmatpush3.msra.mxu0 %v316_v6  ;;  %4155 = vmatpush3.msra.mxu1 %v316_v6  ;;  %v287_v41 = vld [vmem:[%s4703_s18 + $0x60] sm:$0xff]  ;;  %v304_v42 = vld [vmem:[%s4703_s18 + $0xe8] sm:$0xff]  ;;  %v305_v44 = vld [vmem:[%s4703_s18 + $0xf0] sm:$0xff] }
  0x63   : > { %4067 = vmatprep.subr.mxu0 %v315_v7  ;;  %4140 = vmatprep.subr.mxu1 %v315_v7  ;;  %v288_v43 = vld [vmem:[%s4703_s18 + $0x68] sm:$0xff]  ;;  %v289_v45 = vld [vmem:[%s4703_s18 + $0x70] sm:$0xff]  ;;  %v306_v46 = vld [vmem:[%s4703_s18 + $0xf8] sm:$0xff] }
  0x64   : > { %4068 = vmatpush3.msra.mxu0 %v315_v7  ;;  %4156 = vmatpush3.msra.mxu1 %v315_v7  ;;  %v290_v47 = vld [vmem:[%s4703_s18 + $0x78] sm:$0xff]  ;;  %v4748_v48 = vld [vmem:[%s5796_s2] ss:$0 sm:$0xff] }
  0x65   : > { %4069 = vmatprep.subr.mxu0 %v314_v8  ;;  %4141 = vmatprep.subr.mxu1 %v314_v8  ;;  %v4763_v7 = vld [vmem:[%s5797_s3] ss:$0 sm:$0xff] }
  0x66   : > { %4070 = vmatpush3.msra.mxu0 %v314_v8  ;;  %4157 = vmatpush3.msra.mxu1 %v314_v8 }
  0x67   : > { %4071 = vmatprep.subr.mxu0 %v313_v9  ;;  %4142 = vmatprep.subr.mxu1 %v313_v9 }
  0x68   : > { %4072 = vmatpush3.msra.mxu0 %v313_v9  ;;  %4158 = vmatpush3.msra.mxu1 %v313_v9 }
  0x69   : > { %4073 = vmatprep.subr.mxu0 %v312_v10  ;;  %4143 = vmatprep.subr.mxu1 %v312_v10 }
  0x6a   : > { %4074 = vmatpush3.msra.mxu0 %v312_v10  ;;  %4159 = vmatpush3.msra.mxu1 %v312_v10 }
  0x6b   : > { %4075 = vmatprep.subr.mxu0 %v311_v11  ;;  %4144 = vmatprep.subr.mxu1 %v311_v11 }
  0x6c   : > { %4076 = vmatpush3.msra.mxu0 %v311_v11  ;;  %4160 = vmatpush3.msra.mxu1 %v311_v11 }
  0x6d   : > { %4077 = vmatprep.subr.mxu0 %v310_v12  ;;  %4145 = vmatprep.subr.mxu1 %v310_v12 }
  0x6e   : > { %4078 = vmatpush3.msra.mxu0 %v310_v12  ;;  %4161 = vmatpush3.msra.mxu1 %v310_v12 }
  0x6f   : > { %4079 = vmatprep.subr.mxu0 %v309_v13  ;;  %4146 = vmatprep.subr.mxu1 %v309_v13 }
  0x70   : > { %4080 = vmatpush3.msra.mxu0 %v309_v13  ;;  %4162 = vmatpush3.msra.mxu1 %v309_v13 }
  0x71   : > { %4081 = vmatprep.subr.mxu0 %v308_v14  ;;  %4147 = vmatprep.subr.mxu1 %v308_v14 }
  0x72   : > { %4082 = vmatpush3.msra.mxu0 %v308_v14  ;;  %4163 = vmatpush3.msra.mxu1 %v308_v14 }
  0x73   : > { %4083 = vmatprep.subr.mxu0 %v307_v15  ;;  %4148 = vmatprep.subr.mxu1 %v307_v15 }
  0x74   : > { %4084 = vmatpush3.msra.mxu0 %v307_v15  ;;  %4164 = vmatpush3.msra.mxu1 %v307_v15 }
  0x75   : > { %4085 = vmatprep.mubr.f32.mxu0 %v275_v16  ;;  %4109 = vmatprep.mubr.f32.mxu1 %v291_v17 }
  0x76   : > { %4086 = vmatmul.mubr.f32.vlgmr.msra.gmra.mxu0 %v276_v18  ;;  %4110 = vmatmul.mubr.f32.vlgmr.msra.gmra.mxu1 %v292_v19 }
  0x77   : > { %4088 = vmatprep.mubr.f32.mxu0 %v277_v20  ;;  %4112 = vmatprep.mubr.f32.mxu1 %v293_v21 }
  0x7a   : > { %4089 = vmatmul.mubr.f32.gmra.mxu0 %v278_v22  ;;  %4113 = vmatmul.mubr.f32.gmra.mxu1 %v294_v23 }
  0x7b   : > { %4091 = vmatprep.mubr.f32.mxu0 %v279_v24  ;;  %4115 = vmatprep.mubr.f32.mxu1 %v295_v25 }
  0x7e   : > { %4092 = vmatmul.mubr.f32.gmra.mxu0 %v280_v26  ;;  %4116 = vmatmul.mubr.f32.gmra.mxu1 %v296_v27 }
  0x7f   : > { %4094 = vmatprep.mubr.f32.mxu0 %v281_v28  ;;  %4118 = vmatprep.mubr.f32.mxu1 %v297_v29 }
  0x82   : > { %4095 = vmatmul.mubr.f32.gmra.mxu0 %v282_v30  ;;  %4119 = vmatmul.mubr.f32.gmra.mxu1 %v298_v31 }
  0x83   : > { %4097 = vmatprep.mubr.f32.mxu0 %v283_v32  ;;  %4121 = vmatprep.mubr.f32.mxu1 %v299_v33 }
  0x86   : > { %4098 = vmatmul.mubr.f32.gmra.mxu0 %v284_v34  ;;  %4122 = vmatmul.mubr.f32.gmra.mxu1 %v300_v35 }
  0x87   : > { %4124 = vmatprep.mubr.f32.mxu1 %v301_v36  ;;  %4100 = vmatprep.mubr.f32.mxu0 %v285_v37 }
  0x8a   : > { %4125 = vmatmul.mubr.f32.gmra.mxu1 %v302_v38  ;;  %4101 = vmatmul.mubr.f32.gmra.mxu0 %v286_v39 }
  0x8b   : > { %4127 = vmatprep.mubr.f32.mxu1 %v303_v40  ;;  %4103 = vmatprep.mubr.f32.mxu0 %v287_v41 }
  0x8e   : > { %4128 = vmatmul.mubr.f32.gmra.mxu1 %v304_v42  ;;  %4104 = vmatmul.mubr.f32.gmra.mxu0 %v288_v43 }
  0x8f   : > { %4130 = vmatprep.mubr.f32.mxu1 %v305_v44  ;;  %4106 = vmatprep.mubr.f32.mxu0 %v289_v45 }
  0x92   : > { %4131 = vmatmul.mubr.f32.gmra.mxu1 %v306_v46  ;;  %4107 = vmatmul.mubr.f32.gmra.mxu0 %v290_v47 }
 0x136   : > { %v4087_v49 = vpop.f32.mrf.mxu0  ;;  %v4111_v50 = vpop.f32.mrf.mxu1 }
 0x137   : > { %v402_v51 = vadd.f32 %v4087_v49, %v4748_v48  ;;  %v482_v52 = vadd.f32 %v4111_v50, %v4748_v48 }
 0x138   : > { %v396_v53 = vpop.f32.mrf.mxu0  ;;  %v476_v54 = vpop.f32.mrf.mxu1 }
 0x139   : > { %4223 = vtanh.f32 %v402_v51  ;;  %v397_v55 = vadd.f32 %v4748_v48, %v396_v53  ;;  %v477_v59 = vadd.f32 %v4748_v48, %v476_v54 }
 0x13a   : > { %4225 = vtanh.f32 %v482_v52  ;;  %v4090_v56 = vpop.f32.mrf.mxu0  ;;  %v4114_v57 = vpop.f32.mrf.mxu1 }
 0x13b   : > { %4227 = vtanh.f32 %v397_v55  ;;  %v412_v58 = vadd.f32 %v4090_v56, %v4748_v48  ;;  %v492_v60 = vadd.f32 %v4114_v57, %v4748_v48 }
 0x13c   : > { %v406_v61 = vpop.f32.mrf.mxu0  ;;  %v486_v62 = vpop.f32.mrf.mxu1 }
 0x13d   : > { %4229 = vtanh.f32 %v412_v58  ;;  %v487_v63 = vadd.f32 %v4748_v48, %v486_v62  ;;  %v407_v2 = vadd.f32 %v4748_v48, %v406_v61 }
 0x13e   : > { %4231 = vtanh.f32 %v492_v60  ;;  %v4093_v0 = vpop.f32.mrf.mxu0  ;;  %v4117_v1 = vpop.f32.mrf.mxu1 }
 0x13f   : > { %4233 = vtanh.f32 %v477_v59  ;;  %v422_v3 = vadd.f32 %v4093_v0, %v4748_v48  ;;  %v502_v4 = vadd.f32 %v4117_v1, %v4748_v48 }
 0x140   : > { %4235 = vtanh.f32 %v487_v63  ;;  %v416_v5 = vpop.f32.mrf.mxu0  ;;  %v496_v6 = vpop.f32.mrf.mxu1 }
 0x141   : > { %4237 = vtanh.f32 %v407_v2  ;;  %v417_v8 = vadd.f32 %v4748_v48, %v416_v5  ;;  %v497_v10 = vadd.f32 %v4748_v48, %v496_v6 }
 0x142   : > { %4239 = vtanh.f32 %v422_v3  ;;  %v4096_v11 = vpop.f32.mrf.mxu0  ;;  %v4120_v14 = vpop.f32.mrf.mxu1 }
 0x143   : > { %4241 = vtanh.f32 %v502_v4  ;;  %v432_v17 = vadd.f32 %v4096_v11, %v4748_v48  ;;  %v512_v19 = vadd.f32 %v4120_v14, %v4748_v48 }
 0x144   : > { %4243 = vtanh.f32 %v417_v8  ;;  %v426_v20 = vpop.f32.mrf.mxu0  ;;  %v506_v24 = vpop.f32.mrf.mxu1 }
 0x145   : > { %4245 = vtanh.f32 %v497_v10  ;;  %v427_v26 = vadd.f32 %v4748_v48, %v426_v20  ;;  %v507_v29 = vadd.f32 %v4748_v48, %v506_v24 }
 0x146   : > { %v4224_v9 = vpop.eup %4223  ;;  %4247 = vtanh.f32 %v432_v17  ;;  %v4099_v30 = vpop.f32.mrf.mxu0 }
 0x147   : > { %v4226_v12 = vpop.eup %4225  ;;  %v595_v13 = vmul.f32 %v4224_v9, %v4763_v7  ;;  %4249 = vtanh.f32 %v512_v19  ;;  %v4123_v32 = vpop.f32.mrf.mxu1  ;;  %v442_v35 = vadd.f32 %v4099_v30, %v4748_v48 }
 0x148   : > { %v4228_v15 = vpop.eup %4227  ;;  %v611_v16 = vmul.f32 %v4226_v12, %v4763_v7  ;;  %4251 = vtanh.f32 %v427_v26  ;;  %v522_v37 = vadd.f32 %v4123_v32, %v4748_v48  ;;  %v436_v38 = vpop.f32.mrf.mxu0 }
 0x149   : > { %628 = vadd.xlane.f32.xlu0 %v595_v13  ;;  %v594_v23 = vmul.f32 %v4228_v15, %v4763_v7  ;;  %4253 = vtanh.f32 %v507_v29  ;;  %v516_v40 = vpop.f32.mrf.mxu1  ;;  %v437_v43 = vadd.f32 %v4748_v48, %v436_v38 }
 0x14a   : > { %v4230_v18 = vpop.eup %4229  ;;  %660 = vadd.xlane.f32.xlu1 %v611_v16  ;;  %4255 = vtanh.f32 %v442_v35  ;;  %v517_v46 = vadd.f32 %v4748_v48, %v516_v40  ;;  %v4102_v47 = vpop.f32.mrf.mxu0 }
 0x14b   : > { %v4232_v21 = vpop.eup %4231  ;;  %v597_v22 = vmul.f32 %v4230_v18, %v4763_v7  ;;  %4257 = vtanh.f32 %v522_v37  ;;  %v4126_v50 = vpop.f32.mrf.mxu1  ;;  %v452_v52 = vadd.f32 %v4102_v47, %v4748_v48 }
 0x14c   : > { %v4234_v25 = vpop.eup %4233  ;;  %v613_v28 = vmul.f32 %v4232_v21, %v4763_v7  ;;  %4259 = vtanh.f32 %v437_v43  ;;  %v532_v55 = vadd.f32 %v4126_v50, %v4748_v48  ;;  %v446_v56 = vpop.f32.mrf.mxu0 }
 0x14d   : > { %626 = vadd.xlane.f32.xlu0 %v594_v23  ;;  %v4236_v27 = vpop.eup %4235  ;;  %v610_v31 = vmul.f32 %v4234_v25, %v4763_v7  ;;  %4261 = vtanh.f32 %v517_v46  ;;  %v526_v58 = vpop.f32.mrf.mxu1  ;;  %v447_v62 = vadd.f32 %v4748_v48, %v446_v56 }
 0x14e   : > { %632 = vadd.xlane.f32.xlu1 %v597_v22  ;;  %v4238_v33 = vpop.eup %4237  ;;  %v612_v34 = vmul.f32 %v4236_v27, %v4763_v7  ;;  %v4105_v59 = vpop.f32.mrf.mxu0  ;;  %4263 = vtanh.f32 %v452_v52  ;;  %v527_v1 = vadd.f32 %v4748_v48, %v526_v58  ;;  %v4543_v52 = vmov 0  }
 0x14f   : > { %v4240_v36 = vpop.eup %4239  ;;  %v596_v41 = vmul.f32 %v4238_v33, %v4763_v7  ;;  %v4129_v61 = vpop.f32.mrf.mxu1  ;;  %4265 = vtanh.f32 %v532_v55  ;;  %v462_v6 = vadd.f32 %v4105_v59, %v4748_v48  ;;  %4221 = vset.pattern.permute.xlu1 %v4543_v52  ;;  %4222 = vset.pattern.permute.xlu0 %v4543_v52 }
 0x150   : > { %v4242_v39 = vpop.eup %4241  ;;  %v599_v42 = vmul.f32 %v4240_v36, %v4763_v7  ;;  %v456_v2 = vpop.f32.mrf.mxu0  ;;  %4267 = vtanh.f32 %v447_v62  ;;  %v542_v10 = vadd.f32 %v4129_v61, %v4748_v48 }
 0x151   : > { %658 = vadd.xlane.f32.xlu0 %v610_v31  ;;  %v4244_v44 = vpop.eup %4243  ;;  %v615_v45 = vmul.f32 %v4242_v39, %v4763_v7  ;;  %v536_v4 = vpop.f32.mrf.mxu1  ;;  %4269 = vtanh.f32 %v527_v1  ;;  %v457_v15 = vadd.f32 %v4748_v48, %v456_v2 }
 0x152   : > { %664 = vadd.xlane.f32.xlu1 %v613_v28  ;;  %v4246_v49 = vpop.eup %4245  ;;  %v598_v51 = vmul.f32 %v4244_v44, %v4763_v7  ;;  %v4108_v11 = vpop.f32.mrf.mxu0  ;;  %4271 = vtanh.f32 %v462_v6  ;;  %v537_v18 = vadd.f32 %v4748_v48, %v536_v4 }
 0x153   : > { %v4248_v53 = vpop.eup %4247  ;;  %v614_v54 = vmul.f32 %v4246_v49, %v4763_v7  ;;  %v4132_v13 = vpop.f32.mrf.mxu1  ;;  %4273 = vtanh.f32 %v542_v10  ;;  %v472_v28 = vadd.f32 %v4108_v11, %v4748_v48 }
 0x154   : > { %v4250_v57 = vpop.eup %4249  ;;  %v601_v60 = vmul.f32 %v4248_v53, %v4763_v7  ;;  %v466_v19 = vpop.f32.mrf.mxu0  ;;  %4275 = vtanh.f32 %v457_v15  ;;  %v552_v31 = vadd.f32 %v4132_v13, %v4748_v48  ;;  %v4819_v53 = vstv %s690_s12 }
 0x155   : > { %662 = vadd.xlane.f32.xlu0 %v612_v34  ;;  %v4252_v63 = vpop.eup %4251  ;;  %v617_v0 = vmul.f32 %v4250_v57, %v4763_v7  ;;  %v546_v21 = vpop.f32.mrf.mxu1  ;;  %v467_v23 = vadd.f32 %v4748_v48, %v466_v19  ;;  %4277 = vtanh.f32 %v537_v18 }
 0x156   : > { %630 = vadd.xlane.f32.xlu1 %v596_v41  ;;  %v4254_v3 = vpop.eup %4253  ;;  %v600_v5 = vmul.f32 %v4252_v63, %v4763_v7  ;;  %v547_v26 = vadd.f32 %v4748_v48, %v546_v21 }
 0x157   : > { %v4256_v8 = vpop.eup %4255  ;;  %v616_v9 = vmul.f32 %v4254_v3, %v4763_v7  ;;  %4279 = vtanh.f32 %v467_v23 }
 0x158   : > { %v4258_v12 = vpop.eup %4257  ;;  %v603_v14 = vmul.f32 %v4256_v8, %v4763_v7  ;;  %4281 = vtanh.f32 %v547_v26 }
 0x159   : > { %636 = vadd.xlane.f32.xlu0 %v599_v42  ;;  %v4260_v16 = vpop.eup %4259  ;;  %v619_v17 = vmul.f32 %v4258_v12, %v4763_v7  ;;  %4283 = vtanh.f32 %v472_v28 }
 0x15a   : > { %668 = vadd.xlane.f32.xlu1 %v615_v45  ;;  %v4262_v20 = vpop.eup %4261  ;;  %v602_v22 = vmul.f32 %v4260_v16, %v4763_v7  ;;  %4285 = vtanh.f32 %v552_v31 }
 0x15b   : > { %v4264_v24 = vpop.eup %4263  ;;  %v618_v25 = vmul.f32 %v4262_v20, %v4763_v7 }
 0x15c   : > { %v4266_v27 = vpop.eup %4265  ;;  %v605_v29 = vmul.f32 %v4264_v24, %v4763_v7 }
 0x15d   : > { %634 = vadd.xlane.f32.xlu0 %v598_v51  ;;  %v4268_v30 = vpop.eup %4267  ;;  %v621_v32 = vmul.f32 %v4266_v27, %v4763_v7  ;;  %v948_v27 = vlaneseq }
 0x15e   : > { %666 = vadd.xlane.f32.xlu1 %v614_v54  ;;  %v4270_v33 = vpop.eup %4269  ;;  %v604_v34 = vmul.f32 %v4268_v30, %v4763_v7 }
 0x15f   : > { %v4272_v35 = vpop.eup %4271  ;;  %v620_v36 = vmul.f32 %v4270_v33, %v4763_v7  ;;  %vm3844_vm15 = vcmp.lt.s32.totalorder %v948_v27, 256 }
 0x160   : > { %v4274_v37 = vpop.eup %4273  ;;  %v607_v38 = vmul.f32 %v4272_v35, %v4763_v7 }
 0x161   : > { %640 = vadd.xlane.f32.xlu0 %v601_v60  ;;  %v4276_v39 = vpop.eup %4275  ;;  %v623_v48 = vmul.f32 %v4274_v37, %v4763_v7 }
 0x162   : > { %672 = vadd.xlane.f32.xlu1 %v617_v0  ;;  %v4278_v40 = vpop.eup %4277  ;;  %v606_v41 = vmul.f32 %v4276_v39, %v4763_v7 }
 0x163   : > { %v622_v43 = vmul.f32 %v4278_v40, %v4763_v7  ;;  %v4544_v40 = vmov 1966171168  }
 0x164   : > { %v4280_v42 = vpop.eup %4279 }
 0x165   : > { %638 = vadd.xlane.f32.xlu0 %v600_v5  ;;  %v4282_v44 = vpop.eup %4281  ;;  %v608_v45 = vmul.f32 %v4280_v42, %v4763_v7 }
 0x166   : > { %670 = vadd.xlane.f32.xlu1 %v616_v9  ;;  %v4284_v46 = vpop.eup %4283  ;;  %v624_v47 = vmul.f32 %v4282_v44, %v4763_v7 }
 0x167   : > { %v4286_v49 = vpop.eup %4285  ;;  %v609_v50 = vmul.f32 %v4284_v46, %v4763_v7 }
 0x168   : > { %v625_v51 = vmul.f32 %v4286_v49, %v4763_v7 }
 0x169   : > { %644 = vadd.xlane.f32.xlu0 %v603_v14 }
 0x16a   : > { %676 = vadd.xlane.f32.xlu1 %v619_v17 }
 0x16d   : > { %642 = vadd.xlane.f32.xlu0 %v602_v22 }
 0x16e   : > { %674 = vadd.xlane.f32.xlu1 %v618_v25 }
 0x171   : > { %648 = vadd.xlane.f32.xlu0 %v605_v29 }
 0x172   : > { %680 = vadd.xlane.f32.xlu1 %v621_v32 }
 0x175   : > { %646 = vadd.xlane.f32.xlu0 %v604_v34 }
 0x176   : > { %678 = vadd.xlane.f32.xlu1 %v620_v36 }
 0x179   : > { %652 = vadd.xlane.f32.xlu0 %v607_v38  ;;  %v4835_v38 = vshrl.u32 %v948_v27, 7 }
 0x17a   : > { %684 = vadd.xlane.f32.xlu1 %v623_v48 }
 0x17b   : > { %v4843_v52 = vsub.s32 1, %v4835_v38 }
 0x17d   : > { %650 = vadd.xlane.f32.xlu0 %v606_v41  ;;  %v1977_v41 = vunpack.c.l.s4 %v4544_v40 }
 0x17e   : > { %682 = vadd.xlane.f32.xlu1 %v622_v43 }
 0x181   : > { %654 = vadd.xlane.f32.xlu0 %v608_v45 }
 0x182   : > { %686 = vadd.xlane.f32.xlu1 %v624_v47 }
 0x185   : > { %656 = vadd.xlane.f32.xlu0 %v609_v50 }
 0x186   : > { %688 = vadd.xlane.f32.xlu1 %v625_v51  ;;  %v4840_v51 = vsub.s32 0, %v4835_v38 }
 0x1d2   : > { %v629_v54 = vpop.xlane.xlu0 %628 }
 0x1d3   : > { %v661_v55 = vpop.xlane.xlu1 %660  ;;  %v693_v56 = vadd.f32 %v4819_v53, %v629_v54 }
 0x1d4   : > { %v709_v57 = vadd.f32 %v4819_v53, %v661_v55 }
 0x1d5   : > { %v3965_v58 = vmul.f32 -1.442695, %v693_v56  ;;  %v4847_v56 = vsub.s32 2, %v4835_v38 }
 0x1d6   : > { %v3981_v59 = vmul.f32 -1.442695, %v709_v57  ;;  %v627_v60 = vpop.xlane.xlu0 %626  ;;  %v1978_v57 = vunpack.c.0.s8 %v1977_v41 }
 0x1d7   : > { %4287 = vpow2.f32 %v3965_v58  ;;  %v633_v61 = vpop.xlane.xlu1 %632  ;;  %v692_v7 = vadd.f32 %v4819_v53, %v627_v60  ;;  %v4850_v60 = vsub.s32 3, %v4835_v38 }
 0x1d8   : > { %4289 = vpow2.f32 %v3981_v59  ;;  %v695_v62 = vadd.f32 %v4819_v53, %v633_v61  ;;  %v4853_v61 = vsub.s32 4, %v4835_v38 }
 0x1d9   : > { %v3964_v63 = vmul.f32 -1.442695, %v692_v7 }
 0x1da   : > { %v3967_v0 = vmul.f32 -1.442695, %v695_v62  ;;  %v659_v1 = vpop.xlane.xlu0 %658 }
 0x1db   : > { %4291 = vpow2.f32 %v3964_v63  ;;  %v665_v2 = vpop.xlane.xlu1 %664  ;;  %v708_v3 = vadd.f32 %v4819_v53, %v659_v1 }
 0x1dc   : > { %4293 = vpow2.f32 %v3967_v0  ;;  %v711_v4 = vadd.f32 %v4819_v53, %v665_v2 }
 0x1dd   : > { %v3980_v5 = vmul.f32 -1.442695, %v708_v3  ;;  %v4857_v3 = vsub.s32 5, %v4835_v38 }
 0x1de   : > { %v3983_v6 = vmul.f32 -1.442695, %v711_v4  ;;  %v663_v8 = vpop.xlane.xlu0 %662  ;;  %v4860_v4 = vsub.s32 6, %v4835_v38 }
 0x1df   : > { %4295 = vpow2.f32 %v3980_v5  ;;  %v631_v9 = vpop.xlane.xlu1 %630  ;;  %v710_v10 = vadd.f32 %v4819_v53, %v663_v8  ;;  %v4864_v8 = vsub.s32 7, %v4835_v38 }
 0x1e0   : > { %4297 = vpow2.f32 %v3983_v6  ;;  %v694_v11 = vadd.f32 %v4819_v53, %v631_v9  ;;  %v4867_v9 = vsub.s32 %v1978_v57, %v4835_v38 }
 0x1e1   : > { %v3982_v12 = vmul.f32 -1.442695, %v710_v10 }
 0x1e2   : > { %v3966_v13 = vmul.f32 -1.442695, %v694_v11  ;;  %v637_v14 = vpop.xlane.xlu0 %636 }
 0x1e3   : > { %4299 = vpow2.f32 %v3982_v12  ;;  %v669_v15 = vpop.xlane.xlu1 %668  ;;  %v697_v16 = vadd.f32 %v4819_v53, %v637_v14 }
 0x1e4   : > { %v4288_v17 = vpop.eup %4287  ;;  %4301 = vpow2.f32 %v3966_v13  ;;  %v713_v18 = vadd.f32 %v4819_v53, %v669_v15 }
 0x1e5   : > { %v4290_v19 = vpop.eup %4289  ;;  %v821_v20 = vadd.f32 1.0, %v4288_v17  ;;  %v3969_v23 = vmul.f32 -1.442695, %v697_v16 }
 0x1e6   : > { %v837_v21 = vadd.f32 1.0, %v4290_v19  ;;  %v3985_v22 = vmul.f32 -1.442695, %v713_v18  ;;  %v635_v24 = vpop.xlane.xlu0 %634 }
 0x1e7   : > { %4303 = vrcp.f32 %v821_v20  ;;  %v667_v25 = vpop.xlane.xlu1 %666  ;;  %v696_v26 = vadd.f32 %v4819_v53, %v635_v24 }
 0x1e8   : > { %v4292_v28 = vpop.eup %4291  ;;  %4305 = vrcp.f32 %v837_v21  ;;  %v712_v29 = vadd.f32 %v4819_v53, %v667_v25 }
 0x1e9   : > { %v4294_v30 = vpop.eup %4293  ;;  %v820_v31 = vadd.f32 1.0, %v4292_v28  ;;  %4307 = vpow2.f32 %v3985_v22  ;;  %v3968_v34 = vmul.f32 -1.442695, %v696_v26 }
 0x1ea   : > { %v823_v32 = vadd.f32 1.0, %v4294_v30  ;;  %4309 = vpow2.f32 %v3969_v23  ;;  %v3984_v33 = vmul.f32 -1.442695, %v712_v29  ;;  %v641_v35 = vpop.xlane.xlu0 %640 }
 0x1eb   : > { %4311 = vrcp.f32 %v820_v31  ;;  %v673_v36 = vpop.xlane.xlu1 %672  ;;  %v699_v37 = vadd.f32 %v4819_v53, %v641_v35 }
 0x1ec   : > { %v4296_v39 = vpop.eup %4295  ;;  %4313 = vrcp.f32 %v823_v32  ;;  %v715_v48 = vadd.f32 %v4819_v53, %v673_v36 }
 0x1ed   : > { %v4298_v42 = vpop.eup %4297  ;;  %v836_v43 = vadd.f32 1.0, %v4296_v39  ;;  %4315 = vpow2.f32 %v3984_v33  ;;  %v3971_v46 = vmul.f32 -1.442695, %v699_v37 }
 0x1ee   : > { %v839_v44 = vadd.f32 1.0, %v4298_v42  ;;  %4317 = vpow2.f32 %v3968_v34  ;;  %v3987_v45 = vmul.f32 -1.442695, %v715_v48  ;;  %v639_v47 = vpop.xlane.xlu0 %638 }
 0x1ef   : > { %4319 = vrcp.f32 %v836_v43  ;;  %v671_v49 = vpop.xlane.xlu1 %670  ;;  %v698_v50 = vadd.f32 %v4819_v53, %v639_v47 }
 0x1f0   : > { %v4300_v54 = vpop.eup %4299  ;;  %4321 = vrcp.f32 %v839_v44  ;;  %v714_v55 = vadd.f32 %v4819_v53, %v671_v49 }
 0x1f1   : > { %v4302_v58 = vpop.eup %4301  ;;  %v838_v59 = vadd.f32 1.0, %v4300_v54  ;;  %4323 = vpow2.f32 %v3987_v45  ;;  %v3970_v63 = vmul.f32 -1.442695, %v698_v50 }
 0x1f2   : > { %v822_v7 = vadd.f32 1.0, %v4302_v58  ;;  %4325 = vpow2.f32 %v3971_v46  ;;  %v3986_v62 = vmul.f32 -1.442695, %v714_v55  ;;  %v645_v0 = vpop.xlane.xlu0 %644 }
 0x1f3   : > { %4327 = vrcp.f32 %v838_v59  ;;  %v677_v1 = vpop.xlane.xlu1 %676  ;;  %v701_v2 = vadd.f32 %v4819_v53, %v645_v0 }
 0x1f4   : > { %v4304_v5 = vpop.eup %4303  ;;  %4329 = vrcp.f32 %v822_v7  ;;  %v717_v6 = vadd.f32 %v4819_v53, %v677_v1 }
 0x1f5   : > { %v4869_v10 = vpop.eup %4305  ;;  %4331 = vpow2.f32 %v3986_v62  ;;  %v3973_v11 = vmul.f32 -1.442695, %v701_v2  ;;  %v983_v12 = vrot.slane %v4304_v5, %v4840_v51  ;;  %v987_v13 = vrot.slane %v4304_v5, %v4843_v52 }
 0x1f6   : > { %v4308_v14 = vpop.eup %4307  ;;  %4333 = vpow2.f32 %v3970_v63  ;;  %v3989_v15 = vmul.f32 -1.442695, %v717_v6  ;;  %v643_v16 = vpop.xlane.xlu0 %642  ;;  %v991_v17 = vrot.slane %v4304_v5, %v4847_v56  ;;  %v995_v18 = vrot.slane %v4304_v5, %v4850_v60 }
 0x1f7   : > { %v4310_v19 = vpop.eup %4309  ;;  %v841_v20 = vadd.f32 1.0, %v4308_v14  ;;  %4335 = vpow2.f32 %v3973_v11  ;;  %v675_v21 = vpop.xlane.xlu1 %674  ;;  %v700_v22 = vadd.f32 %v4819_v53, %v643_v16  ;;  %v999_v23 = vrot.slane %v4304_v5, %v4853_v61 }
 0x1f8   : > { %v4877_v24 = vpop.eup %4311  ;;  %v825_v25 = vadd.f32 1.0, %v4310_v19  ;;  %4337 = vpow2.f32 %v3989_v15  ;;  %v716_v26 = vadd.f32 %v4819_v53, %v675_v21  ;;  %v1003_v28 = vrot.slane %v4304_v5, %v4857_v3 }
 0x1f9   : > { %v4881_v29 = vpop.eup %4313  ;;  %4339 = vrcp.f32 %v841_v20  ;;  %v3972_v30 = vmul.f32 -1.442695, %v700_v22  ;;  %v1007_v31 = vrot.slane %v4304_v5, %v4860_v4  ;;  %v1011_v32 = vrot.slane %v4304_v5, %v4864_v8 }
 0x1fa   : > { %v4316_v33 = vpop.eup %4315  ;;  %4341 = vrcp.f32 %v825_v25  ;;  %v3988_v34 = vmul.f32 -1.442695, %v716_v26  ;;  %v649_v35 = vpop.xlane.xlu0 %648  ;;  %v2021_v36 = vcombine.low %v983_v12, %v987_v13  ;;  %v2022_v37 = vcombine.low %v991_v17, %v995_v18 }
 0x1fb   : > { %v4318_v39 = vpop.eup %4317  ;;  %v840_v48 = vadd.f32 1.0, %v4316_v33  ;;  %v681_v40 = vpop.xlane.xlu1 %680  ;;  %4343 = vpow2.f32 %v3972_v30  ;;  %v703_v41 = vadd.f32 %v4819_v53, %v649_v35  ;;  %v2023_v42 = vcombine.low %v999_v23, %v1003_v28 }
 0x1fc   : > { %v4886_v43 = vpop.eup %4319  ;;  %v824_v44 = vadd.f32 1.0, %v4318_v39  ;;  %4345 = vpow2.f32 %v3988_v34  ;;  %v719_v45 = vadd.f32 %v4819_v53, %v681_v40  ;;  %v2024_v46 = vcombine.low %v1007_v31, %v1011_v32 }
 0x1fd   : > { %v4889_v47 = vpop.eup %4321  ;;  %4347 = vrcp.f32 %v840_v48  ;;  %v3975_v49 = vmul.f32 -1.442695, %v703_v41  ;;  %v2031_v50 = vrot.slane %v2021_v36, %v4867_v9  ;;  %v2038_v54 = vrot.slane %v2022_v37, %v4867_v9 }
 0x1fe   : > { %v4324_v55 = vpop.eup %4323  ;;  %4349 = vrcp.f32 %v824_v44  ;;  %v3991_v57 = vmul.f32 -1.442695, %v719_v45  ;;  %v2045_v58 = vrot.slane %v2023_v42, %v4867_v9  ;;  %v2052_v59 = vrot.slane %v2024_v46, %v4867_v9  ;;  %v647_v7 = vpop.xlane.xlu0 %646 }
 0x1ff   : > { %v4326_v62 = vpop.eup %4325  ;;  %v843_v63 = vadd.f32 1.0, %v4324_v55  ;;  %v679_v0 = vpop.xlane.xlu1 %678  ;;  %4351 = vpow2.f32 %v3975_v49  ;;  %v2053_v1 = vcombine.low %v2031_v50, %v2038_v54  ;;  %v702_v2 = vadd.f32 %v4819_v53, %v647_v7 }
 0x200   : > { %v4896_v5 = vpop.eup %4327  ;;  %v827_v6 = vadd.f32 1.0, %v4326_v62  ;;  %4353 = vpow2.f32 %v3991_v57  ;;  %v718_v11 = vadd.f32 %v4819_v53, %v679_v0  ;;  %v2054_v12 = vcombine.low %v2045_v58, %v2052_v59 }
 0x201   : > { %v4899_v13 = vpop.eup %4329  ;;  %4355 = vrcp.f32 %v843_v63  ;;  %v2061_v14 = vrot.slane %v2053_v1, %v4867_v9  ;;  %v3974_v15 = vmul.f32 -1.442695, %v702_v2  ;;  %v1495_v16 = vrot.slane %v4869_v10, %v4840_v51 }
 0x202   : > { %v4332_v17 = vpop.eup %4331  ;;  %4357 = vrcp.f32 %v827_v6  ;;  %v3990_v18 = vmul.f32 -1.442695, %v718_v11  ;;  %v2068_v19 = vrot.slane %v2054_v12, %v4867_v9  ;;  %v1499_v20 = vrot.slane %v4869_v10, %v4843_v52 }
 0x203   : > { %v4334_v21 = vpop.eup %4333  ;;  %v842_v22 = vadd.f32 1.0, %v4332_v17  ;;  %v685_v23 = vpop.xlane.xlu1 %684  ;;  %4359 = vpow2.f32 %v3974_v15  ;;  %v1503_v25 = vrot.slane %v4869_v10, %v4847_v56  ;;  %v1507_v26 = vrot.slane %v4869_v10, %v4850_v60 }
 0x204   : > { %v4336_v28 = vpop.eup %4335  ;;  %v826_v30 = vadd.f32 1.0, %v4334_v21  ;;  %4361 = vpow2.f32 %v3990_v18  ;;  %v2069_v31 = vcombine.low %v2061_v14, %v2068_v19  ;;  %v721_v32 = vadd.f32 %v4819_v53, %v685_v23 }
 0x205   : > { %v4338_v33 = vpop.eup %4337  ;;  %4363 = vrcp.f32 %v842_v22  ;;  %v829_v34 = vadd.f32 1.0, %v4336_v28  ;;  %v1511_v35 = vrot.slane %v4869_v10, %v4853_v61  ;;  %v1515_v36 = vrot.slane %v4869_v10, %v4857_v3 }
 0x206   : > { %v4916_v37 = vpop.eup %4339  ;;  %4365 = vrcp.f32 %v826_v30  ;;  %v845_v39 = vadd.f32 1.0, %v4338_v33  ;;  %3544 = vperm.xlu1 %4221, %v2069_v31   ;;  %v3993_v48 = vmul.f32 -1.442695, %v721_v32  ;;  %v1519_v40 = vrot.slane %v4869_v10, %v4860_v4 }
 0x207   : > { %v4920_v41 = vpop.eup %4341  ;;  %4367 = vrcp.f32 %v829_v34  ;;  %v1523_v42 = vrot.slane %v4869_v10, %v4864_v8  ;;  %v2805_v44 = vcombine.low %v1495_v16, %v1499_v20  ;;  %v2806_v45 = vcombine.low %v1503_v25, %v1507_v26  ;;  %v683_v22 = vpop.xlane.xlu1 %682 }
 0x208   : > { %v4344_v46 = vpop.eup %4343  ;;  %4369 = vrcp.f32 %v845_v39  ;;  %v2807_v49 = vcombine.low %v1511_v35, %v1515_v36  ;;  %v951_v50 = vrot.slane %v4877_v24, %v4840_v51  ;;  %v955_v54 = vrot.slane %v4877_v24, %v4843_v52 }
 0x209   : > { %v4346_v55 = vpop.eup %4345  ;;  %v828_v57 = vadd.f32 1.0, %v4344_v46  ;;  %4371 = vpow2.f32 %v3993_v48  ;;  %v2808_v58 = vcombine.low %v1519_v40, %v1523_v42  ;;  %v2815_v59 = vrot.slane %v2805_v44, %v4867_v9  ;;  %v653_v48 = vpop.xlane.xlu0 %652 }
 0x20a   : > { %v4929_v7 = vpop.eup %4347  ;;  %v844_v10 = vadd.f32 1.0, %v4346_v55  ;;  %v2822_v62 = vrot.slane %v2806_v45, %v4867_v9  ;;  %v2829_v63 = vrot.slane %v2807_v49, %v4867_v9  ;;  %v959_v0 = vrot.slane %v4877_v24, %v4847_v56 }
 0x20b   : > { %v4935_v1 = vpop.eup %4349  ;;  %4373 = vrcp.f32 %v828_v57  ;;  %v2836_v2 = vrot.slane %v2808_v58, %v4867_v9  ;;  %v963_v6 = vrot.slane %v4877_v24, %v4850_v60  ;;  %v967_v11 = vrot.slane %v4877_v24, %v4853_v61 }
 0x20c   : > { %v4352_v12 = vpop.eup %4351  ;;  %4375 = vrcp.f32 %v844_v10  ;;  %v2837_v14 = vcombine.low %v2815_v59, %v2822_v62  ;;  %v971_v15 = vrot.slane %v4877_v24, %v4857_v3  ;;  %v975_v16 = vrot.slane %v4877_v24, %v4860_v4 }
 0x20d   : > { %v4354_v17 = vpop.eup %4353  ;;  %v831_v18 = vadd.f32 1.0, %v4352_v12  ;;  %v2838_v19 = vcombine.low %v2829_v63, %v2836_v2  ;;  %v979_v20 = vrot.slane %v4877_v24, %v4864_v8  ;;  %v1972_v21 = vcombine.low %v951_v50, %v955_v54 }
 0x20e   : > { %v4948_v23 = vpop.eup %4355  ;;  %v847_v25 = vadd.f32 1.0, %v4354_v17  ;;  %v2845_v26 = vrot.slane %v2837_v14, %v4867_v9  ;;  %v1973_v28 = vcombine.low %v959_v0, %v963_v6  ;;  %v1974_v30 = vcombine.low %v967_v11, %v971_v15 }
 0x20f   : > { %v4951_v31 = vpop.eup %4357  ;;  %4377 = vrcp.f32 %v831_v18  ;;  %v2852_v32 = vrot.slane %v2838_v19, %v4867_v9  ;;  %v1975_v33 = vcombine.low %v975_v16, %v979_v20  ;;  %v1982_v34 = vrot.slane %v1972_v21, %v4867_v9 }
 0x210   : > { %v4360_v35 = vpop.eup %4359  ;;  %4379 = vrcp.f32 %v847_v25  ;;  %v1989_v24 = vrot.slane %v1973_v28, %v4867_v9  ;;  %v1996_v36 = vrot.slane %v1974_v30, %v4867_v9  ;;  %v720_v39 = vadd.f32 %v4819_v53, %v683_v22 }
 0x211   : > { %v4362_v40 = vpop.eup %4361  ;;  %v830_v42 = vadd.f32 1.0, %v4360_v35  ;;  %v2853_v44 = vcombine.low %v2845_v26, %v2852_v32  ;;  %v2003_v45 = vrot.slane %v1975_v33, %v4867_v9  ;;  %v705_v46 = vadd.f32 %v4819_v53, %v653_v48 }
 0x212   : > { %v4960_v49 = vpop.eup %4363  ;;  %v846_v50 = vadd.f32 1.0, %v4362_v40  ;;  %v2004_v54 = vcombine.low %v1982_v34, %v1989_v24  ;;  %v3992_v55 = vmul.f32 -1.442695, %v720_v39  ;;  %v1047_v57 = vrot.slane %v4881_v29, %v4840_v51 }
 0x213   : > { %v4964_v58 = vpop.eup %4365  ;;  %4381 = vrcp.f32 %v830_v42  ;;  %3592 = vperm.xlu1 %4221, %v2853_v44   ;;  %v2005_v59 = vcombine.low %v1996_v36, %v2003_v45  ;;  %v3977_v10 = vmul.f32 -1.442695, %v705_v46  ;;  %v1051_v62 = vrot.slane %v4881_v29, %v4843_v52  ;;  %v687_v36 = vpop.xlane.xlu1 %686 }
 0x214   : > { %v4968_v63 = vpop.eup %4367  ;;  %4383 = vrcp.f32 %v846_v50  ;;  %v2012_v0 = vrot.slane %v2004_v54, %v4867_v9  ;;  %v1055_v2 = vrot.slane %v4881_v29, %v4847_v56  ;;  %v1059_v6 = vrot.slane %v4881_v29, %v4850_v60 }
 0x215   : > { %v4975_v11 = vpop.eup %4369  ;;  %v2019_v12 = vrot.slane %v2005_v59, %v4867_v9  ;;  %4385 = vpow2.f32 %v3992_v55  ;;  %v1063_v14 = vrot.slane %v4881_v29, %v4853_v61  ;;  %v1067_v15 = vrot.slane %v4881_v29, %v4857_v3 }
 0x216   : > { %v4372_v16 = vpop.eup %4371  ;;  %4387 = vpow2.f32 %v3977_v10  ;;  %v1071_v17 = vrot.slane %v4881_v29, %v4860_v4  ;;  %v1075_v18 = vrot.slane %v4881_v29, %v4864_v8  ;;  %v2119_v19 = vcombine.low %v1047_v57, %v1051_v62  ;;  %v651_v62 = vpop.xlane.xlu0 %650 }
 0x217   : > { %v849_v20 = vadd.f32 1.0, %v4372_v16  ;;  %v2020_v21 = vcombine.low %v2012_v0, %v2019_v12  ;;  %v2120_v22 = vcombine.low %v1055_v2, %v1059_v6  ;;  %v2121_v25 = vcombine.low %v1063_v14, %v1067_v15 }
 0x218   : > { %v4986_v26 = vpop.eup %4373  ;;  %v2122_v28 = vcombine.low %v1071_v17, %v1075_v18  ;;  %v2129_v30 = vrot.slane %v2119_v19, %v4867_v9  ;;  %v1463_v32 = vrot.slane %v4886_v43, %v4840_v51  ;;  %v1467_v33 = vrot.slane %v4886_v43, %v4843_v52 }
 0x219   : > { %v4993_v34 = vpop.eup %4375  ;;  %4389 = vrcp.f32 %v849_v20  ;;  %3541 = vperm.xlu0 %4222, %v2020_v21   ;;  %v2136_v29 = vrot.slane %v2120_v22, %v4867_v9  ;;  %v2143_v35 = vrot.slane %v2121_v25, %v4867_v9  ;;  %v1471_v24 = vrot.slane %v4886_v43, %v4847_v56 }
 0x21a   : > { %v2150_v39 = vrot.slane %v2122_v28, %v4867_v9  ;;  %v1475_v48 = vrot.slane %v4886_v43, %v4850_v60  ;;  %v1479_v40 = vrot.slane %v4886_v43, %v4853_v61  ;;  %v1483_v42 = vrot.slane %v4886_v43, %v4857_v3 }
 0x21b   : > { %v2151_v44 = vcombine.low %v2129_v30, %v2136_v29  ;;  %v1487_v45 = vrot.slane %v4886_v43, %v4860_v4  ;;  %v1491_v46 = vrot.slane %v4886_v43, %v4864_v8  ;;  %v2756_v50 = vcombine.low %v1463_v32, %v1467_v33 }
 0x21c   : > { %v5010_v54 = vpop.eup %4377  ;;  %v2152_v55 = vcombine.low %v2143_v35, %v2150_v39  ;;  %v2757_v57 = vcombine.low %v1471_v24, %v1475_v48  ;;  %v2758_v59 = vcombine.low %v1479_v40, %v1483_v42  ;;  %v722_v10 = vadd.f32 %v4819_v53, %v687_v36 }
 0x21d   : > { %v5013_v0 = vpop.eup %4379  ;;  %v2159_v2 = vrot.slane %v2151_v44, %v4867_v9  ;;  %v2759_v6 = vcombine.low %v1487_v45, %v1491_v46  ;;  %v2766_v12 = vrot.slane %v2756_v50, %v4867_v9  ;;  %v704_v14 = vadd.f32 %v4819_v53, %v651_v62 }
 0x21e   : > { %v2166_v43 = vrot.slane %v2152_v55, %v4867_v9  ;;  %v2773_v15 = vrot.slane %v2757_v57, %v4867_v9  ;;  %v2780_v16 = vrot.slane %v2758_v59, %v4867_v9  ;;  %v3994_v17 = vmul.f32 -1.442695, %v722_v10 }
 0x21f   : > { %v2787_v18 = vrot.slane %v2759_v6, %v4867_v9  ;;  %v3976_v19 = vmul.f32 -1.442695, %v704_v14  ;;  %v1559_v20 = vrot.slane %v4889_v47, %v4840_v51  ;;  %v1563_v21 = vrot.slane %v4889_v47, %v4843_v52 }
 0x220   : > { %v5026_v22 = vpop.eup %4381  ;;  %v2167_v25 = vcombine.low %v2159_v2, %v2166_v43  ;;  %v2788_v28 = vcombine.low %v2766_v12, %v2773_v15  ;;  %4391 = vpow2.f32 %v3994_v17  ;;  %v1567_v30 = vrot.slane %v4889_v47, %v4847_v56  ;;  %v689_v15 = vpop.xlane.xlu1 %688 }
 0x221   : > { %v5030_v32 = vpop.eup %4383  ;;  %v2789_v33 = vcombine.low %v2780_v16, %v2787_v18  ;;  %4393 = vpow2.f32 %v3976_v19  ;;  %v1571_v29 = vrot.slane %v4889_v47, %v4850_v60  ;;  %v1575_v35 = vrot.slane %v4889_v47, %v4853_v61 }
 0x222   : > { %v4386_v24 = vpop.eup %4385  ;;  %3550 = vperm.xlu1 %4221, %v2167_v25   ;;  %v2796_v36 = vrot.slane %v2788_v28, %v4867_v9  ;;  %v1579_v39 = vrot.slane %v4889_v47, %v4857_v3  ;;  %v1583_v48 = vrot.slane %v4889_v47, %v4860_v4  ;;  %v1587_v40 = vrot.slane %v4889_v47, %v4864_v8 }
 0x223   : > { %v4388_v42 = vpop.eup %4387  ;;  %v848_v44 = vadd.f32 1.0, %v4386_v24  ;;  %v2803_v45 = vrot.slane %v2789_v33, %v4867_v9  ;;  %v2903_v46 = vcombine.low %v1559_v20, %v1563_v21  ;;  %v2904_v50 = vcombine.low %v1567_v30, %v1571_v29  ;;  %v655_v24 = vpop.xlane.xlu0 %654 }
 0x224   : > { %v833_v55 = vadd.f32 1.0, %v4388_v42  ;;  %v2905_v57 = vcombine.low %v1575_v35, %v1579_v39  ;;  %v2906_v59 = vcombine.low %v1583_v48, %v1587_v40  ;;  %v1527_v10 = vrot.slane %v4896_v5, %v4840_v51 }
 0x225   : > { %4395 = vrcp.f32 %v848_v44  ;;  %v2804_v62 = vcombine.low %v2796_v36, %v2803_v45  ;;  %v2913_v2 = vrot.slane %v2903_v46, %v4867_v9  ;;  %v2920_v6 = vrot.slane %v2904_v50, %v4867_v9 }
 0x226   : > { %v5048_v12 = vpop.eup %4389  ;;  %4397 = vrcp.f32 %v833_v55  ;;  %v2927_v47 = vrot.slane %v2905_v57, %v4867_v9  ;;  %v2934_v14 = vrot.slane %v2906_v59, %v4867_v9  ;;  %v1531_v43 = vrot.slane %v4896_v5, %v4843_v52 }
 0x227   : > { %3589 = vperm.xlu0 %4222, %v2804_v62   ;;  %v2935_v16 = vcombine.low %v2913_v2, %v2920_v6  ;;  %v1535_v17 = vrot.slane %v4896_v5, %v4847_v56  ;;  %v1539_v18 = vrot.slane %v4896_v5, %v4850_v60  ;;  %v1543_v19 = vrot.slane %v4896_v5, %v4853_v61 }
 0x228   : > { %v2936_v20 = vcombine.low %v2927_v47, %v2934_v14  ;;  %v1547_v21 = vrot.slane %v4896_v5, %v4857_v3  ;;  %v1551_v25 = vrot.slane %v4896_v5, %v4860_v4  ;;  %v1555_v28 = vrot.slane %v4896_v5, %v4864_v8 }
 0x229   : > { %v2943_v30 = vrot.slane %v2935_v16, %v4867_v9  ;;  %v2854_v33 = vcombine.low %v1527_v10, %v1531_v43  ;;  %v2855_v29 = vcombine.low %v1535_v17, %v1539_v18  ;;  %v723_v35 = vadd.f32 %v4819_v53, %v689_v15 }
 0x22a   : > { %v2950_v36 = vrot.slane %v2936_v20, %v4867_v9  ;;  %v2856_v39 = vcombine.low %v1543_v19, %v1547_v21  ;;  %v2857_v48 = vcombine.low %v1551_v25, %v1555_v28  ;;  %v706_v40 = vadd.f32 %v4819_v53, %v655_v24  ;;  %v657_v19 = vpop.xlane.xlu0 %656 }
 0x22b   : > { %v2864_v42 = vrot.slane %v2854_v33, %v4867_v9  ;;  %v2871_v44 = vrot.slane %v2855_v29, %v4867_v9  ;;  %v3995_v45 = vmul.f32 -1.442695, %v723_v35  ;;  %v1015_v5 = vrot.slane %v4899_v13, %v4840_v51 }
 0x22c   : > { %v2951_v46 = vcombine.low %v2943_v30, %v2950_v36  ;;  %v2878_v50 = vrot.slane %v2856_v39, %v4867_v9  ;;  %v2885_v55 = vrot.slane %v2857_v48, %v4867_v9  ;;  %v3978_v57 = vmul.f32 -1.442695, %v706_v40 }
 0x22d   : > { %v4392_v59 = vpop.eup %4391  ;;  %v2886_v10 = vcombine.low %v2864_v42, %v2871_v44  ;;  %4399 = vpow2.f32 %v3995_v45  ;;  %v1019_v62 = vrot.slane %v4899_v13, %v4843_v52  ;;  %v1023_v2 = vrot.slane %v4899_v13, %v4847_v56 }
 0x22e   : > { %v4394_v6 = vpop.eup %4393  ;;  %v850_v47 = vadd.f32 1.0, %v4392_v59  ;;  %3598 = vperm.xlu1 %4221, %v2951_v46   ;;  %v2887_v14 = vcombine.low %v2878_v50, %v2885_v55  ;;  %4401 = vpow2.f32 %v3978_v57  ;;  %v1027_v43 = vrot.slane %v4899_v13, %v4850_v60 }
 0x22f   : > { %v832_v15 = vadd.f32 1.0, %v4394_v6  ;;  %v2894_v16 = vrot.slane %v2886_v10, %v4867_v9  ;;  %v1031_v17 = vrot.slane %v4899_v13, %v4853_v61  ;;  %v1035_v18 = vrot.slane %v4899_v13, %v4857_v3 }
 0x230   : > { %4403 = vrcp.f32 %v850_v47  ;;  %v2901_v20 = vrot.slane %v2887_v14, %v4867_v9  ;;  %v1039_v21 = vrot.slane %v4899_v13, %v4860_v4  ;;  %v1043_v25 = vrot.slane %v4899_v13, %v4864_v8 }
 0x231   : > { %4405 = vrcp.f32 %v832_v15  ;;  %v2070_v28 = vcombine.low %v1015_v5, %v1019_v62  ;;  %v2071_v30 = vcombine.low %v1023_v2, %v1027_v43  ;;  %v2072_v33 = vcombine.low %v1031_v17, %v1035_v18 }
 0x232   : > { %v5092_v29 = vpop.eup %4395  ;;  %v2902_v35 = vcombine.low %v2894_v16, %v2901_v20  ;;  %v2073_v24 = vcombine.low %v1039_v21, %v1043_v25  ;;  %v707_v36 = vadd.f32 %v4819_v53, %v657_v19  ;;  %v1591_v39 = vrot.slane %v4929_v7, %v4840_v51 }
 0x233   : > { %v5097_v48 = vpop.eup %4397  ;;  %v2080_v40 = vrot.slane %v2070_v28, %v4867_v9  ;;  %v2087_v42 = vrot.slane %v2071_v30, %v4867_v9  ;;  %v2094_v13 = vrot.slane %v2072_v33, %v4867_v9  ;;  %v1595_v44 = vrot.slane %v4929_v7, %v4843_v52 }
 0x234   : > { %3595 = vperm.xlu0 %4222, %v2902_v35   ;;  %v2101_v45 = vrot.slane %v2073_v24, %v4867_v9  ;;  %v3979_v5 = vmul.f32 -1.442695, %v707_v36  ;;  %v1599_v53 = vrot.slane %v4929_v7, %v4847_v56  ;;  %v1603_v46 = vrot.slane %v4929_v7, %v4850_v60 }
 0x235   : > { %v2102_v50 = vcombine.low %v2080_v40, %v2087_v42  ;;  %v1607_v55 = vrot.slane %v4929_v7, %v4853_v61  ;;  %v1611_v57 = vrot.slane %v4929_v7, %v4857_v3  ;;  %v1615_v59 = vrot.slane %v4929_v7, %v4860_v4 }
 0x236   : > { %v2103_v10 = vcombine.low %v2094_v13, %v2101_v45  ;;  %4407 = vpow2.f32 %v3979_v5  ;;  %v1619_v62 = vrot.slane %v4929_v7, %v4864_v8  ;;  %v2952_v2 = vcombine.low %v1591_v39, %v1595_v44 }
 0x237   : > { %v2110_v6 = vrot.slane %v2102_v50, %v4867_v9  ;;  %v2953_v47 = vcombine.low %v1599_v53, %v1603_v46  ;;  %v2954_v14 = vcombine.low %v1607_v55, %v1611_v57  ;;  %v1111_v43 = vrot.slane %v4920_v41, %v4840_v51 }
 0x238   : > { %v2117_v15 = vrot.slane %v2103_v10, %v4867_v9  ;;  %v2955_v16 = vcombine.low %v1615_v59, %v1619_v62  ;;  %v2962_v17 = vrot.slane %v2952_v2, %v4867_v9  ;;  %v1115_v18 = vrot.slane %v4920_v41, %v4843_v52 }
 0x239   : > { %v2969_v19 = vrot.slane %v2953_v47, %v4867_v9  ;;  %v2976_v7 = vrot.slane %v2954_v14, %v4867_v9  ;;  %v1119_v20 = vrot.slane %v4920_v41, %v4847_v56  ;;  %v1123_v21 = vrot.slane %v4920_v41, %v4850_v60 }
 0x23a   : > { %v4400_v25 = vpop.eup %4399  ;;  %v2118_v28 = vcombine.low %v2110_v6, %v2117_v15  ;;  %v2983_v30 = vrot.slane %v2955_v16, %v4867_v9  ;;  %v1127_v33 = vrot.slane %v4920_v41, %v4853_v61  ;;  %v1131_v35 = vrot.slane %v4920_v41, %v4857_v3 }
 0x23b   : > { %v4402_v24 = vpop.eup %4401  ;;  %v851_v36 = vadd.f32 1.0, %v4400_v25  ;;  %v2984_v39 = vcombine.low %v2962_v17, %v2969_v19  ;;  %v1135_v40 = vrot.slane %v4920_v41, %v4860_v4  ;;  %v1139_v42 = vrot.slane %v4920_v41, %v4864_v8 }
 0x23c   : > { %v834_v13 = vadd.f32 1.0, %v4402_v24  ;;  %3547 = vperm.xlu1 %4221, %v2118_v28   ;;  %v2985_v44 = vcombine.low %v2976_v7, %v2983_v30  ;;  %v2217_v45 = vcombine.low %v1111_v43, %v1115_v18  ;;  %v2218_v5 = vcombine.low %v1119_v20, %v1123_v21 }
 0x23d   : > { %v5139_v53 = vpop.eup %4403  ;;  %4409 = vrcp.f32 %v851_v36  ;;  %v2992_v46 = vrot.slane %v2984_v39, %v4867_v9  ;;  %v2219_v50 = vcombine.low %v1127_v33, %v1131_v35  ;;  %v2220_v55 = vcombine.low %v1135_v40, %v1139_v42 }
 0x23e   : > { %v5142_v57 = vpop.eup %4405  ;;  %4411 = vrcp.f32 %v834_v13  ;;  %v2999_v59 = vrot.slane %v2985_v44, %v4867_v9  ;;  %v2227_v10 = vrot.slane %v2217_v45, %v4867_v9  ;;  %v2234_v41 = vrot.slane %v2218_v5, %v4867_v9 }
 0x23f   : > { %v2241_v62 = vrot.slane %v2219_v50, %v4867_v9  ;;  %v2248_v2 = vrot.slane %v2220_v55, %v4867_v9  ;;  %v1623_v6 = vrot.slane %v4916_v37, %v4840_v51  ;;  %v1627_v47 = vrot.slane %v4916_v37, %v4843_v52 }
 0x240   : > { %v3000_v14 = vcombine.low %v2992_v46, %v2999_v59  ;;  %v2249_v43 = vcombine.low %v2227_v10, %v2234_v41  ;;  %v1631_v15 = vrot.slane %v4916_v37, %v4847_v56  ;;  %v1635_v16 = vrot.slane %v4916_v37, %v4850_v60 }
 0x241   : > { %v2250_v17 = vcombine.low %v2241_v62, %v2248_v2  ;;  %v1639_v18 = vrot.slane %v4916_v37, %v4853_v61  ;;  %v1643_v19 = vrot.slane %v4916_v37, %v4857_v3  ;;  %v1647_v7 = vrot.slane %v4916_v37, %v4860_v4 }
 0x242   : > { %3601 = vperm.xlu0 %4222, %v3000_v14   ;;  %v2257_v20 = vrot.slane %v2249_v43, %v4867_v9  ;;  %v1651_v21 = vrot.slane %v4916_v37, %v4864_v8  ;;  %v3001_v25 = vcombine.low %v1623_v6, %v1627_v47  ;;  %v3002_v28 = vcombine.low %v1631_v15, %v1635_v16 }
 0x243   : > { %v4408_v30 = vpop.eup %4407  ;;  %v2264_v33 = vrot.slane %v2250_v17, %v4867_v9  ;;  %v3003_v35 = vcombine.low %v1639_v18, %v1643_v19  ;;  %v1655_v24 = vrot.slane %v4960_v49, %v4840_v51  ;;  %v1659_v36 = vrot.slane %v4960_v49, %v4843_v52 }
 0x244   : > { %v835_v39 = vadd.f32 1.0, %v4408_v30  ;;  %v3004_v40 = vcombine.low %v1647_v7, %v1651_v21  ;;  %v3011_v42 = vrot.slane %v3001_v25, %v4867_v9  ;;  %v3018_v13 = vrot.slane %v3002_v28, %v4867_v9 }
 0x245   : > { %v2265_v44 = vcombine.low %v2257_v20, %v2264_v33  ;;  %v3025_v37 = vrot.slane %v3003_v35, %v4867_v9  ;;  %v1663_v45 = vrot.slane %v4960_v49, %v4847_v56  ;;  %v1667_v5 = vrot.slane %v4960_v49, %v4850_v60 }
 0x246   : > { %4413 = vrcp.f32 %v835_v39  ;;  %v3032_v46 = vrot.slane %v3004_v40, %v4867_v9  ;;  %v3033_v50 = vcombine.low %v3011_v42, %v3018_v13  ;;  %v1671_v55 = vrot.slane %v4960_v49, %v4853_v61 }
 0x247   : > { %3556 = vperm.xlu1 %4221, %v2265_v44   ;;  %v1675_v59 = vrot.slane %v4960_v49, %v4857_v3  ;;  %v1679_v10 = vrot.slane %v4960_v49, %v4860_v4  ;;  %v1683_v41 = vrot.slane %v4960_v49, %v4864_v8  ;;  %v3050_v62 = vcombine.low %v1655_v24, %v1659_v36 }
 0x248   : > { %v3034_v2 = vcombine.low %v3025_v37, %v3032_v46  ;;  %v3041_v6 = vrot.slane %v3033_v50, %v4867_v9  ;;  %v3051_v47 = vcombine.low %v1663_v45, %v1667_v5  ;;  %v1079_v14 = vrot.slane %v4935_v1, %v4840_v51 }
 0x249   : > { %v3052_v43 = vcombine.low %v1671_v55, %v1675_v59  ;;  %v3053_v15 = vcombine.low %v1679_v10, %v1683_v41  ;;  %v3060_v16 = vrot.slane %v3050_v62, %v4867_v9  ;;  %v1083_v17 = vrot.slane %v4935_v1, %v4843_v52 }
 0x24a   : > { %v5193_v18 = vpop.eup %4409  ;;  %v3048_v19 = vrot.slane %v3034_v2, %v4867_v9  ;;  %v3067_v49 = vrot.slane %v3051_v47, %v4867_v9  ;;  %v1087_v7 = vrot.slane %v4935_v1, %v4847_v56  ;;  %v1091_v20 = vrot.slane %v4935_v1, %v4850_v60 }
 0x24b   : > { %v5201_v21 = vpop.eup %4411  ;;  %v3074_v25 = vrot.slane %v3052_v43, %v4867_v9  ;;  %v3081_v28 = vrot.slane %v3053_v15, %v4867_v9  ;;  %v1095_v30 = vrot.slane %v4935_v1, %v4853_v61  ;;  %v1099_v33 = vrot.slane %v4935_v1, %v4857_v3 }
 0x24c   : > { %v3049_v35 = vcombine.low %v3041_v6, %v3048_v19  ;;  %v3082_v24 = vcombine.low %v3060_v16, %v3067_v49  ;;  %v1103_v36 = vrot.slane %v4935_v1, %v4860_v4  ;;  %v1107_v39 = vrot.slane %v4935_v1, %v4864_v8 }
 0x24d   : > { %v3083_v40 = vcombine.low %v3074_v25, %v3081_v28  ;;  %v2168_v42 = vcombine.low %v1079_v14, %v1083_v17  ;;  %v2169_v13 = vcombine.low %v1087_v7, %v1091_v20  ;;  %v2170_v44 = vcombine.low %v1095_v30, %v1099_v33 }
 0x24e   : > { %3604 = vperm.xlu1 %4221, %v3049_v35   ;;  %v3090_v37 = vrot.slane %v3082_v24, %v4867_v9  ;;  %v2171_v45 = vcombine.low %v1103_v36, %v1107_v39  ;;  %v1175_v5 = vrot.slane %v4951_v31, %v4840_v51  ;;  %v1179_v46 = vrot.slane %v4951_v31, %v4843_v52 }
 0x24f   : > { %v3097_v50 = vrot.slane %v3083_v40, %v4867_v9  ;;  %v2178_v55 = vrot.slane %v2168_v42, %v4867_v9  ;;  %v2185_v1 = vrot.slane %v2169_v13, %v4867_v9  ;;  %v2192_v59 = vrot.slane %v2170_v44, %v4867_v9 }
 0x250   : > { %v2199_v10 = vrot.slane %v2171_v45, %v4867_v9  ;;  %v1183_v41 = vrot.slane %v4951_v31, %v4847_v56  ;;  %v1187_v62 = vrot.slane %v4951_v31, %v4850_v60  ;;  %v1191_v2 = vrot.slane %v4951_v31, %v4853_v61 }
 0x251   : > { %v3098_v6 = vcombine.low %v3090_v37, %v3097_v50  ;;  %v2200_v47 = vcombine.low %v2178_v55, %v2185_v1  ;;  %v1195_v14 = vrot.slane %v4951_v31, %v4857_v3  ;;  %v1199_v43 = vrot.slane %v4951_v31, %v4860_v4 }
 0x252   : > { %v2201_v15 = vcombine.low %v2192_v59, %v2199_v10  ;;  %v1203_v16 = vrot.slane %v4951_v31, %v4864_v8  ;;  %v2315_v17 = vcombine.low %v1175_v5, %v1179_v46  ;;  %v2316_v19 = vcombine.low %v1183_v41, %v1187_v62 }
 0x253   : > { %v5235_v49 = vpop.eup %4413  ;;  %3607 = vperm.xlu0 %4222, %v3098_v6   ;;  %v2208_v7 = vrot.slane %v2200_v47, %v4867_v9  ;;  %v2317_v20 = vcombine.low %v1191_v2, %v1195_v14  ;;  %v1239_v25 = vrot.slane %v4968_v63, %v4840_v51  ;;  %v1243_v28 = vrot.slane %v4968_v63, %v4843_v52 }
 0x254   : > { %v2215_v30 = vrot.slane %v2201_v15, %v4867_v9  ;;  %v2318_v33 = vcombine.low %v1199_v43, %v1203_v16  ;;  %v2325_v35 = vrot.slane %v2315_v17, %v4867_v9  ;;  %v2332_v31 = vrot.slane %v2316_v19, %v4867_v9 }
 0x255   : > { %v2339_v24 = vrot.slane %v2317_v20, %v4867_v9  ;;  %v1247_v36 = vrot.slane %v4968_v63, %v4847_v56  ;;  %v1251_v39 = vrot.slane %v4968_v63, %v4850_v60  ;;  %v1255_v40 = vrot.slane %v4968_v63, %v4853_v61 }
 0x256   : > { %v2216_v42 = vcombine.low %v2208_v7, %v2215_v30  ;;  %v2346_v13 = vrot.slane %v2318_v33, %v4867_v9  ;;  %v2347_v44 = vcombine.low %v2325_v35, %v2332_v31  ;;  %v1259_v37 = vrot.slane %v4968_v63, %v4857_v3 }
 0x257   : > { %v1263_v45 = vrot.slane %v4968_v63, %v4860_v4  ;;  %v1267_v5 = vrot.slane %v4968_v63, %v4864_v8  ;;  %v2413_v46 = vcombine.low %v1239_v25, %v1243_v28  ;;  %v2414_v50 = vcombine.low %v1247_v36, %v1251_v39 }
 0x258   : > { %3553 = vperm.xlu1 %4221, %v2216_v42   ;;  %v2348_v55 = vcombine.low %v2339_v24, %v2346_v13  ;;  %v2355_v1 = vrot.slane %v2347_v44, %v4867_v9  ;;  %v2415_v59 = vcombine.low %v1255_v40, %v1259_v37  ;;  %v1687_v10 = vrot.slane %v4948_v23, %v4840_v51 }
 0x259   : > { %v2416_v41 = vcombine.low %v1263_v45, %v1267_v5  ;;  %v2423_v62 = vrot.slane %v2413_v46, %v4867_v9  ;;  %v2430_v2 = vrot.slane %v2414_v50, %v4867_v9  ;;  %v1691_v6 = vrot.slane %v4948_v23, %v4843_v52 }
 0x25a   : > { %v2362_v63 = vrot.slane %v2348_v55, %v4867_v9  ;;  %v2437_v47 = vrot.slane %v2415_v59, %v4867_v9  ;;  %v1695_v14 = vrot.slane %v4948_v23, %v4847_v56  ;;  %v1699_v43 = vrot.slane %v4948_v23, %v4850_v60 }
 0x25b   : > { %v2444_v15 = vrot.slane %v2416_v41, %v4867_v9  ;;  %v2445_v16 = vcombine.low %v2423_v62, %v2430_v2  ;;  %v1703_v17 = vrot.slane %v4948_v23, %v4853_v61  ;;  %v1707_v19 = vrot.slane %v4948_v23, %v4857_v3 }
 0x25c   : > { %v2363_v7 = vcombine.low %v2355_v1, %v2362_v63  ;;  %v1711_v20 = vrot.slane %v4948_v23, %v4860_v4  ;;  %v1715_v25 = vrot.slane %v4948_v23, %v4864_v8  ;;  %v3099_v28 = vcombine.low %v1687_v10, %v1691_v6 }
 0x25d   : > { %v2446_v30 = vcombine.low %v2437_v47, %v2444_v15  ;;  %v2453_v33 = vrot.slane %v2445_v16, %v4867_v9  ;;  %v3100_v35 = vcombine.low %v1695_v14, %v1699_v43  ;;  %v3101_v31 = vcombine.low %v1703_v17, %v1707_v19 }
 0x25e   : > { %3562 = vperm.xlu1 %4221, %v2363_v7   ;;  %v3102_v24 = vcombine.low %v1711_v20, %v1715_v25  ;;  %v3109_v36 = vrot.slane %v3099_v28, %v4867_v9  ;;  %v1719_v39 = vrot.slane %v4993_v34, %v4840_v51  ;;  %v1723_v40 = vrot.slane %v4993_v34, %v4843_v52 }
 0x25f   : > { %v2460_v42 = vrot.slane %v2446_v30, %v4867_v9  ;;  %v3116_v23 = vrot.slane %v3100_v35, %v4867_v9  ;;  %v3123_v13 = vrot.slane %v3101_v31, %v4867_v9  ;;  %v1727_v44 = vrot.slane %v4993_v34, %v4847_v56 }
 0x260   : > { %v3130_v37 = vrot.slane %v3102_v24, %v4867_v9  ;;  %v1731_v45 = vrot.slane %v4993_v34, %v4850_v60  ;;  %v1735_v5 = vrot.slane %v4993_v34, %v4853_v61  ;;  %v1739_v46 = vrot.slane %v4993_v34, %v4857_v3 }
 0x261   : > { %v2461_v50 = vcombine.low %v2453_v33, %v2460_v42  ;;  %v3131_v55 = vcombine.low %v3109_v36, %v3116_v23  ;;  %v1743_v1 = vrot.slane %v4993_v34, %v4860_v4  ;;  %v1747_v59 = vrot.slane %v4993_v34, %v4864_v8 }
 0x262   : > { %v3132_v10 = vcombine.low %v3123_v13, %v3130_v37  ;;  %v3148_v41 = vcombine.low %v1719_v39, %v1723_v40  ;;  %v3149_v62 = vcombine.low %v1727_v44, %v1731_v45  ;;  %v3150_v2 = vcombine.low %v1735_v5, %v1739_v46 }
 0x263   : > { %3568 = vperm.xlu0 %4222, %v2461_v50   ;;  %v3139_v6 = vrot.slane %v3131_v55, %v4867_v9  ;;  %v3151_v63 = vcombine.low %v1743_v1, %v1747_v59  ;;  %v1143_v47 = vrot.slane %v4964_v58, %v4840_v51  ;;  %v1147_v14 = vrot.slane %v4964_v58, %v4843_v52 }
 0x264   : > { %v3146_v43 = vrot.slane %v3132_v10, %v4867_v9  ;;  %v3158_v15 = vrot.slane %v3148_v41, %v4867_v9  ;;  %v3165_v34 = vrot.slane %v3149_v62, %v4867_v9  ;;  %v3172_v16 = vrot.slane %v3150_v2, %v4867_v9 }
 0x265   : > { %v3179_v17 = vrot.slane %v3151_v63, %v4867_v9  ;;  %v1151_v19 = vrot.slane %v4964_v58, %v4847_v56  ;;  %v1155_v7 = vrot.slane %v4964_v58, %v4850_v60  ;;  %v1159_v20 = vrot.slane %v4964_v58, %v4853_v61 }
 0x266   : > { %v3147_v25 = vcombine.low %v3139_v6, %v3146_v43  ;;  %v3180_v28 = vcombine.low %v3158_v15, %v3165_v34  ;;  %v1163_v30 = vrot.slane %v4964_v58, %v4857_v3  ;;  %v1167_v33 = vrot.slane %v4964_v58, %v4860_v4 }
 0x267   : > { %v3181_v35 = vcombine.low %v3172_v16, %v3179_v17  ;;  %v1171_v31 = vrot.slane %v4964_v58, %v4864_v8  ;;  %v2266_v24 = vcombine.low %v1143_v47, %v1147_v14  ;;  %v2267_v36 = vcombine.low %v1151_v19, %v1155_v7 }
 0x268   : > { %3610 = vperm.xlu1 %4221, %v3147_v25   ;;  %v3188_v39 = vrot.slane %v3180_v28, %v4867_v9  ;;  %v2268_v40 = vcombine.low %v1159_v20, %v1163_v30  ;;  %v1815_v42 = vrot.slane %v5013_v0, %v4840_v51  ;;  %v1819_v23 = vrot.slane %v5013_v0, %v4843_v52 }
 0x269   : > { %v3195_v13 = vrot.slane %v3181_v35, %v4867_v9  ;;  %v2269_v44 = vcombine.low %v1167_v33, %v1171_v31  ;;  %v2276_v37 = vrot.slane %v2266_v24, %v4867_v9  ;;  %v2283_v45 = vrot.slane %v2267_v36, %v4867_v9 }
 0x26a   : > { %v2290_v58 = vrot.slane %v2268_v40, %v4867_v9  ;;  %v1823_v5 = vrot.slane %v5013_v0, %v4847_v56  ;;  %v1827_v46 = vrot.slane %v5013_v0, %v4850_v60  ;;  %v1831_v50 = vrot.slane %v5013_v0, %v4853_v61 }
 0x26b   : > { %v3196_v55 = vcombine.low %v3188_v39, %v3195_v13  ;;  %v2297_v1 = vrot.slane %v2269_v44, %v4867_v9  ;;  %v2298_v59 = vcombine.low %v2276_v37, %v2283_v45  ;;  %v1835_v10 = vrot.slane %v5013_v0, %v4857_v3 }
 0x26c   : > { %v1839_v41 = vrot.slane %v5013_v0, %v4860_v4  ;;  %v1843_v62 = vrot.slane %v5013_v0, %v4864_v8  ;;  %v3295_v2 = vcombine.low %v1815_v42, %v1819_v23  ;;  %v3296_v6 = vcombine.low %v1823_v5, %v1827_v46 }
 0x26d   : > { %3613 = vperm.xlu0 %4222, %v3196_v55   ;;  %v2299_v63 = vcombine.low %v2290_v58, %v2297_v1  ;;  %v2306_v47 = vrot.slane %v2298_v59, %v4867_v9  ;;  %v3297_v14 = vcombine.low %v1831_v50, %v1835_v10  ;;  %v1751_v43 = vrot.slane %v4975_v11, %v4840_v51 }
 0x26e   : > { %v3298_v15 = vcombine.low %v1839_v41, %v1843_v62  ;;  %v3305_v34 = vrot.slane %v3295_v2, %v4867_v9  ;;  %v3312_v16 = vrot.slane %v3296_v6, %v4867_v9  ;;  %v1755_v17 = vrot.slane %v4975_v11, %v4843_v52 }
 0x26f   : > { %v2313_v0 = vrot.slane %v2299_v63, %v4867_v9  ;;  %v3319_v19 = vrot.slane %v3297_v14, %v4867_v9  ;;  %v1759_v7 = vrot.slane %v4975_v11, %v4847_v56  ;;  %v1763_v20 = vrot.slane %v4975_v11, %v4850_v60 }
 0x270   : > { %v3326_v25 = vrot.slane %v3298_v15, %v4867_v9  ;;  %v3327_v28 = vcombine.low %v3305_v34, %v3312_v16  ;;  %v1767_v30 = vrot.slane %v4975_v11, %v4853_v61  ;;  %v1771_v33 = vrot.slane %v4975_v11, %v4857_v3 }
 0x271   : > { %v2314_v35 = vcombine.low %v2306_v47, %v2313_v0  ;;  %v1775_v31 = vrot.slane %v4975_v11, %v4860_v4  ;;  %v1779_v24 = vrot.slane %v4975_v11, %v4864_v8  ;;  %v3197_v36 = vcombine.low %v1751_v43, %v1755_v17 }
 0x272   : > { %v3328_v39 = vcombine.low %v3319_v19, %v3326_v25  ;;  %v3335_v40 = vrot.slane %v3327_v28, %v4867_v9  ;;  %v3198_v42 = vcombine.low %v1759_v7, %v1763_v20  ;;  %v3199_v23 = vcombine.low %v1767_v30, %v1771_v33 }
 0x273   : > { %3559 = vperm.xlu1 %4221, %v2314_v35   ;;  %v3200_v13 = vcombine.low %v1775_v31, %v1779_v24  ;;  %v3207_v44 = vrot.slane %v3197_v36, %v4867_v9  ;;  %v1783_v37 = vrot.slane %v5030_v32, %v4840_v51  ;;  %v1787_v45 = vrot.slane %v5030_v32, %v4843_v52 }
 0x274   : > { %v3342_v58 = vrot.slane %v3328_v39, %v4867_v9  ;;  %v3214_v11 = vrot.slane %v3198_v42, %v4867_v9  ;;  %v3221_v5 = vrot.slane %v3199_v23, %v4867_v9  ;;  %v1791_v46 = vrot.slane %v5030_v32, %v4847_v56 }
 0x275   : > { %v3228_v50 = vrot.slane %v3200_v13, %v4867_v9  ;;  %v1795_v55 = vrot.slane %v5030_v32, %v4850_v60  ;;  %v1799_v1 = vrot.slane %v5030_v32, %v4853_v61  ;;  %v1803_v59 = vrot.slane %v5030_v32, %v4857_v3 }
 0x276   : > { %v3343_v10 = vcombine.low %v3335_v40, %v3342_v58  ;;  %v3229_v41 = vcombine.low %v3207_v44, %v3214_v11  ;;  %v1807_v62 = vrot.slane %v5030_v32, %v4860_v4  ;;  %v1811_v2 = vrot.slane %v5030_v32, %v4864_v8 }
 0x277   : > { %v3230_v6 = vcombine.low %v3221_v5, %v3228_v50  ;;  %v3246_v63 = vcombine.low %v1783_v37, %v1787_v45  ;;  %v3247_v47 = vcombine.low %v1791_v46, %v1795_v55  ;;  %v3248_v14 = vcombine.low %v1799_v1, %v1803_v59 }
 0x278   : > { %3622 = vperm.xlu0 %4222, %v3343_v10   ;;  %v3237_v43 = vrot.slane %v3229_v41, %v4867_v9  ;;  %v3249_v15 = vcombine.low %v1807_v62, %v1811_v2  ;;  %v1879_v34 = vrot.slane %v5048_v12, %v4840_v51  ;;  %v1883_v16 = vrot.slane %v5048_v12, %v4843_v52 }
 0x279   : > { %v3244_v17 = vrot.slane %v3230_v6, %v4867_v9  ;;  %v3256_v0 = vrot.slane %v3246_v63, %v4867_v9  ;;  %v3263_v32 = vrot.slane %v3247_v47, %v4867_v9  ;;  %v3270_v19 = vrot.slane %v3248_v14, %v4867_v9 }
 0x27a   : > { %v3277_v7 = vrot.slane %v3249_v15, %v4867_v9  ;;  %v1887_v20 = vrot.slane %v5048_v12, %v4847_v56  ;;  %v1891_v25 = vrot.slane %v5048_v12, %v4850_v60  ;;  %v1895_v28 = vrot.slane %v5048_v12, %v4853_v61 }
 0x27b   : > { %v3245_v30 = vcombine.low %v3237_v43, %v3244_v17  ;;  %v3278_v33 = vcombine.low %v3256_v0, %v3263_v32  ;;  %v1899_v35 = vrot.slane %v5048_v12, %v4857_v3  ;;  %v1903_v31 = vrot.slane %v5048_v12, %v4860_v4 }
 0x27c   : > { %v3279_v24 = vcombine.low %v3270_v19, %v3277_v7  ;;  %v1907_v36 = vrot.slane %v5048_v12, %v4864_v8  ;;  %v3393_v39 = vcombine.low %v1879_v34, %v1883_v16  ;;  %v3394_v40 = vcombine.low %v1887_v20, %v1891_v25 }
 0x27d   : > { %3616 = vperm.xlu1 %4221, %v3245_v30   ;;  %v3286_v42 = vrot.slane %v3278_v33, %v4867_v9  ;;  %v3395_v23 = vcombine.low %v1895_v28, %v1899_v35  ;;  %v1207_v13 = vrot.slane %v4986_v26, %v4840_v51  ;;  %v1211_v44 = vrot.slane %v4986_v26, %v4843_v52 }
 0x27e   : > { %v3293_v37 = vrot.slane %v3279_v24, %v4867_v9  ;;  %v3396_v45 = vcombine.low %v1903_v31, %v1907_v36  ;;  %v3403_v58 = vrot.slane %v3393_v39, %v4867_v9  ;;  %v3410_v11 = vrot.slane %v3394_v40, %v4867_v9 }
 0x27f   : > { %v3417_v12 = vrot.slane %v3395_v23, %v4867_v9  ;;  %v1215_v5 = vrot.slane %v4986_v26, %v4847_v56  ;;  %v1219_v46 = vrot.slane %v4986_v26, %v4850_v60  ;;  %v1223_v50 = vrot.slane %v4986_v26, %v4853_v61 }
 0x280   : > { %v3294_v55 = vcombine.low %v3286_v42, %v3293_v37  ;;  %v3424_v1 = vrot.slane %v3396_v45, %v4867_v9  ;;  %v3425_v59 = vcombine.low %v3403_v58, %v3410_v11  ;;  %v1227_v10 = vrot.slane %v4986_v26, %v4857_v3 }
 0x281   : > { %v1231_v41 = vrot.slane %v4986_v26, %v4860_v4  ;;  %v1235_v62 = vrot.slane %v4986_v26, %v4864_v8  ;;  %v2364_v2 = vcombine.low %v1207_v13, %v1211_v44  ;;  %v2365_v6 = vcombine.low %v1215_v5, %v1219_v46 }
 0x282   : > { %3619 = vperm.xlu0 %4222, %v3294_v55   ;;  %v3426_v63 = vcombine.low %v3417_v12, %v3424_v1  ;;  %v3433_v47 = vrot.slane %v3425_v59, %v4867_v9  ;;  %v2366_v14 = vcombine.low %v1223_v50, %v1227_v10  ;;  %v1847_v43 = vrot.slane %v5092_v29, %v4840_v51 }
 0x283   : > { %v2367_v15 = vcombine.low %v1231_v41, %v1235_v62  ;;  %v2374_v34 = vrot.slane %v2364_v2, %v4867_v9  ;;  %v2381_v16 = vrot.slane %v2365_v6, %v4867_v9  ;;  %v1851_v17 = vrot.slane %v5092_v29, %v4843_v52 }
 0x284   : > { %v3440_v26 = vrot.slane %v3426_v63, %v4867_v9  ;;  %v2388_v0 = vrot.slane %v2366_v14, %v4867_v9  ;;  %v1855_v32 = vrot.slane %v5092_v29, %v4847_v56  ;;  %v1859_v19 = vrot.slane %v5092_v29, %v4850_v60 }
 0x285   : > { %v2395_v7 = vrot.slane %v2367_v15, %v4867_v9  ;;  %v2396_v20 = vcombine.low %v2374_v34, %v2381_v16  ;;  %v1863_v25 = vrot.slane %v5092_v29, %v4853_v61  ;;  %v1867_v28 = vrot.slane %v5092_v29, %v4857_v3 }
 0x286   : > { %v3441_v30 = vcombine.low %v3433_v47, %v3440_v26  ;;  %v1871_v33 = vrot.slane %v5092_v29, %v4860_v4  ;;  %v1875_v35 = vrot.slane %v5092_v29, %v4864_v8  ;;  %v3344_v31 = vcombine.low %v1847_v43, %v1851_v17 }
 0x287   : > { %v2397_v24 = vcombine.low %v2388_v0, %v2395_v7  ;;  %v2404_v36 = vrot.slane %v2396_v20, %v4867_v9  ;;  %v3345_v39 = vcombine.low %v1855_v32, %v1859_v19  ;;  %v3346_v40 = vcombine.low %v1863_v25, %v1867_v28 }
 0x288   : > { %3628 = vperm.xlu0 %4222, %v3441_v30   ;;  %v3347_v42 = vcombine.low %v1871_v33, %v1875_v35  ;;  %v3354_v23 = vrot.slane %v3344_v31, %v4867_v9  ;;  %v1303_v13 = vrot.slane %v5010_v54, %v4840_v51  ;;  %v1307_v44 = vrot.slane %v5010_v54, %v4843_v52 }
 0x289   : > { %v2411_v37 = vrot.slane %v2397_v24, %v4867_v9  ;;  %v3361_v29 = vrot.slane %v3345_v39, %v4867_v9  ;;  %v3368_v45 = vrot.slane %v3346_v40, %v4867_v9  ;;  %v1311_v58 = vrot.slane %v5010_v54, %v4847_v56 }
 0x28a   : > { %v3375_v11 = vrot.slane %v3347_v42, %v4867_v9  ;;  %v1315_v12 = vrot.slane %v5010_v54, %v4850_v60  ;;  %v1319_v5 = vrot.slane %v5010_v54, %v4853_v61  ;;  %v1323_v46 = vrot.slane %v5010_v54, %v4857_v3 }
 0x28b   : > { %v2412_v50 = vcombine.low %v2404_v36, %v2411_v37  ;;  %v3376_v55 = vcombine.low %v3354_v23, %v3361_v29  ;;  %v1327_v1 = vrot.slane %v5010_v54, %v4860_v4  ;;  %v1331_v59 = vrot.slane %v5010_v54, %v4864_v8 }
 0x28c   : > { %v3377_v10 = vcombine.low %v3368_v45, %v3375_v11  ;;  %v2511_v41 = vcombine.low %v1303_v13, %v1307_v44  ;;  %v2512_v62 = vcombine.low %v1311_v58, %v1315_v12  ;;  %v2513_v2 = vcombine.low %v1319_v5, %v1323_v46 }
 0x28d   : > { %3565 = vperm.xlu1 %4221, %v2412_v50   ;;  %v3384_v6 = vrot.slane %v3376_v55, %v4867_v9  ;;  %v2514_v63 = vcombine.low %v1327_v1, %v1331_v59  ;;  %v1911_v47 = vrot.slane %v5139_v53, %v4840_v51  ;;  %v1915_v14 = vrot.slane %v5139_v53, %v4843_v52 }
 0x28e   : > { %v3391_v43 = vrot.slane %v3377_v10, %v4867_v9  ;;  %v2521_v15 = vrot.slane %v2511_v41, %v4867_v9  ;;  %v2528_v54 = vrot.slane %v2512_v62, %v4867_v9  ;;  %v2535_v34 = vrot.slane %v2513_v2, %v4867_v9 }
 0x28f   : > { %v2542_v16 = vrot.slane %v2514_v63, %v4867_v9  ;;  %v1919_v17 = vrot.slane %v5139_v53, %v4847_v56  ;;  %v1923_v26 = vrot.slane %v5139_v53, %v4850_v60  ;;  %v1927_v0 = vrot.slane %v5139_v53, %v4853_v61 }
 0x290   : > { %v3392_v32 = vcombine.low %v3384_v6, %v3391_v43  ;;  %v2543_v19 = vcombine.low %v2521_v15, %v2528_v54  ;;  %v1931_v7 = vrot.slane %v5139_v53, %v4857_v3  ;;  %v1935_v20 = vrot.slane %v5139_v53, %v4860_v4 }
 0x291   : > { %v2544_v25 = vcombine.low %v2535_v34, %v2542_v16  ;;  %v1939_v28 = vrot.slane %v5139_v53, %v4864_v8  ;;  %v3442_v30 = vcombine.low %v1911_v47, %v1915_v14  ;;  %v3443_v33 = vcombine.low %v1919_v17, %v1923_v26 }
 0x292   : > { %3625 = vperm.xlu0 %4222, %v3392_v32   ;;  %v2551_v35 = vrot.slane %v2543_v19, %v4867_v9  ;;  %v3444_v31 = vcombine.low %v1927_v0, %v1931_v7  ;;  %v1271_v24 = vrot.slane %v5026_v22, %v4840_v51  ;;  %v1275_v36 = vrot.slane %v5026_v22, %v4843_v52 }
 0x293   : > { %v2558_v39 = vrot.slane %v2544_v25, %v4867_v9  ;;  %v3445_v40 = vcombine.low %v1935_v20, %v1939_v28  ;;  %v3452_v42 = vrot.slane %v3442_v30, %v4867_v9  ;;  %v3459_v23 = vrot.slane %v3443_v33, %v4867_v9 }
 0x294   : > { %v3466_v53 = vrot.slane %v3444_v31, %v4867_v9  ;;  %v1279_v13 = vrot.slane %v5026_v22, %v4847_v56  ;;  %v1283_v44 = vrot.slane %v5026_v22, %v4850_v60  ;;  %v1287_v37 = vrot.slane %v5026_v22, %v4853_v61 }
 0x295   : > { %v2559_v29 = vcombine.low %v2551_v35, %v2558_v39  ;;  %v3473_v45 = vrot.slane %v3445_v40, %v4867_v9  ;;  %v3474_v58 = vcombine.low %v3452_v42, %v3459_v23  ;;  %v1291_v11 = vrot.slane %v5026_v22, %v4857_v3 }
 0x296   : > { %v1295_v12 = vrot.slane %v5026_v22, %v4860_v4  ;;  %v1299_v5 = vrot.slane %v5026_v22, %v4864_v8  ;;  %v2462_v46 = vcombine.low %v1271_v24, %v1275_v36  ;;  %v2463_v50 = vcombine.low %v1279_v13, %v1283_v44 }
 0x297   : > { %3574 = vperm.xlu1 %4221, %v2559_v29   ;;  %v3475_v55 = vcombine.low %v3466_v53, %v3473_v45  ;;  %v3482_v1 = vrot.slane %v3474_v58, %v4867_v9  ;;  %v2464_v59 = vcombine.low %v1287_v37, %v1291_v11  ;;  %v1943_v10 = vrot.slane %v5193_v18, %v4840_v51 }
 0x298   : > { %v2465_v41 = vcombine.low %v1295_v12, %v1299_v5  ;;  %v2472_v62 = vrot.slane %v2462_v46, %v4867_v9  ;;  %v2479_v2 = vrot.slane %v2463_v50, %v4867_v9  ;;  %v1947_v6 = vrot.slane %v5193_v18, %v4843_v52 }
 0x299   : > { %v3489_v22 = vrot.slane %v3475_v55, %v4867_v9  ;;  %v2486_v63 = vrot.slane %v2464_v59, %v4867_v9  ;;  %v1951_v47 = vrot.slane %v5193_v18, %v4847_v56  ;;  %v1955_v14 = vrot.slane %v5193_v18, %v4850_v60 }
 0x29a   : > { %v2493_v43 = vrot.slane %v2465_v41, %v4867_v9  ;;  %v2494_v15 = vcombine.low %v2472_v62, %v2479_v2  ;;  %v1959_v54 = vrot.slane %v5193_v18, %v4853_v61  ;;  %v1963_v34 = vrot.slane %v5193_v18, %v4857_v3 }
 0x29b   : > { %v3490_v16 = vcombine.low %v3482_v1, %v3489_v22  ;;  %v1967_v17 = vrot.slane %v5193_v18, %v4860_v4  ;;  %v1971_v26 = vrot.slane %v5193_v18, %v4864_v8  ;;  %v3491_v0 = vcombine.low %v1943_v10, %v1947_v6 }
 0x29c   : > { %v2495_v32 = vcombine.low %v2486_v63, %v2493_v43  ;;  %v2502_v19 = vrot.slane %v2494_v15, %v4867_v9  ;;  %v3492_v7 = vcombine.low %v1951_v47, %v1955_v14  ;;  %v3493_v20 = vcombine.low %v1959_v54, %v1963_v34 }
 0x29d   : > { %3631 = vperm.xlu0 %4222, %v3490_v16   ;;  %v3494_v25 = vcombine.low %v1967_v17, %v1971_v26  ;;  %v3501_v28 = vrot.slane %v3491_v0, %v4867_v9  ;;  %v1367_v30 = vrot.slane %v5097_v48, %v4840_v51  ;;  %v1371_v33 = vrot.slane %v5097_v48, %v4843_v52 }
 0x29e   : > { %v2509_v35 = vrot.slane %v2495_v32, %v4867_v9  ;;  %v3508_v18 = vrot.slane %v3492_v7, %v4867_v9  ;;  %v3515_v31 = vrot.slane %v3493_v20, %v4867_v9  ;;  %v1375_v24 = vrot.slane %v5097_v48, %v4847_v56 }
 0x29f   : > { %v3522_v36 = vrot.slane %v3494_v25, %v4867_v9  ;;  %v1379_v39 = vrot.slane %v5097_v48, %v4850_v60  ;;  %v1383_v40 = vrot.slane %v5097_v48, %v4853_v61  ;;  %v1387_v42 = vrot.slane %v5097_v48, %v4857_v3 }
 0x2a0   : > { %v2510_v23 = vcombine.low %v2502_v19, %v2509_v35  ;;  %v3523_v53 = vcombine.low %v3501_v28, %v3508_v18  ;;  %v1391_v13 = vrot.slane %v5097_v48, %v4860_v4  ;;  %v1395_v44 = vrot.slane %v5097_v48, %v4864_v8 }
 0x2a1   : > { %v3524_v37 = vcombine.low %v3515_v31, %v3522_v36  ;;  %v2609_v29 = vcombine.low %v1367_v30, %v1371_v33  ;;  %v2610_v45 = vcombine.low %v1375_v24, %v1379_v39  ;;  %v2611_v58 = vcombine.low %v1383_v40, %v1387_v42 }
 0x2a2   : > { %3571 = vperm.xlu1 %4221, %v2510_v23   ;;  %v3531_v11 = vrot.slane %v3523_v53, %v4867_v9  ;;  %v2612_v12 = vcombine.low %v1391_v13, %v1395_v44  ;;  %v1335_v5 = vrot.slane %v5142_v57, %v4840_v51  ;;  %v1339_v46 = vrot.slane %v5142_v57, %v4843_v52 }
 0x2a3   : > { %v3538_v50 = vrot.slane %v3524_v37, %v4867_v9  ;;  %v2619_v55 = vrot.slane %v2609_v29, %v4867_v9  ;;  %v2626_v48 = vrot.slane %v2610_v45, %v4867_v9  ;;  %v2633_v1 = vrot.slane %v2611_v58, %v4867_v9 }
 0x2a4   : > { %v2640_v59 = vrot.slane %v2612_v12, %v4867_v9  ;;  %v1343_v10 = vrot.slane %v5142_v57, %v4847_v56  ;;  %v1347_v41 = vrot.slane %v5142_v57, %v4850_v60  ;;  %v1351_v62 = vrot.slane %v5142_v57, %v4853_v61 }
 0x2a5   : > { %v3539_v2 = vcombine.low %v3531_v11, %v3538_v50  ;;  %v2641_v6 = vcombine.low %v2619_v55, %v2626_v48  ;;  %v1355_v22 = vrot.slane %v5142_v57, %v4857_v3  ;;  %v1359_v63 = vrot.slane %v5142_v57, %v4860_v4 }
 0x2a6   : > { %v2642_v47 = vcombine.low %v2633_v1, %v2640_v59  ;;  %v1363_v14 = vrot.slane %v5142_v57, %v4864_v8  ;;  %v2560_v43 = vcombine.low %v1335_v5, %v1339_v46  ;;  %v2561_v15 = vcombine.low %v1343_v10, %v1347_v41 }
 0x2a7   : > { %3634 = vperm.xlu0 %4222, %v3539_v2   ;;  %v2649_v54 = vrot.slane %v2641_v6, %v4867_v9  ;;  %v2562_v34 = vcombine.low %v1351_v62, %v1355_v22  ;;  %v1399_v16 = vrot.slane %v5201_v21, %v4840_v51  ;;  %v1403_v17 = vrot.slane %v5201_v21, %v4843_v52 }
 0x2a8   : > { %v2656_v26 = vrot.slane %v2642_v47, %v4867_v9  ;;  %v2563_v0 = vcombine.low %v1359_v63, %v1363_v14  ;;  %v2570_v32 = vrot.slane %v2560_v43, %v4867_v9  ;;  %v2577_v19 = vrot.slane %v2561_v15, %v4867_v9  ;;  %v3545_v63 = vpop.permute.xlu1 %3544 }
 0x2a9   : > { %v2584_v57 = vrot.slane %v2562_v34, %v4867_v9  ;;  %v1407_v7 = vrot.slane %v5201_v21, %v4847_v56  ;;  %v1411_v20 = vrot.slane %v5201_v21, %v4850_v60  ;;  %v1415_v25 = vrot.slane %v5201_v21, %v4853_v61  ;;  %v3542_v34 = vpop.permute.xlu0 %3541 }
 0x2aa   : > { %v2657_v28 = vcombine.low %v2649_v54, %v2656_v26  ;;  %v2591_v30 = vrot.slane %v2563_v0, %v4867_v9  ;;  %v2592_v33 = vcombine.low %v2570_v32, %v2577_v19  ;;  %v1419_v35 = vrot.slane %v5201_v21, %v4857_v3 }
 0x2ab   : > { %v1423_v18 = vrot.slane %v5201_v21, %v4860_v4  ;;  %v1427_v31 = vrot.slane %v5201_v21, %v4864_v8  ;;  %v2658_v24 = vcombine.low %v1399_v16, %v1403_v17  ;;  %v2659_v36 = vcombine.low %v1407_v7, %v1411_v20 }
 0x2ac   : > { %3580 = vperm.xlu1 %4221, %v2657_v28   ;;  %v2593_v39 = vcombine.low %v2584_v57, %v2591_v30  ;;  %v2600_v40 = vrot.slane %v2592_v33, %v4867_v9  ;;  %v2660_v42 = vcombine.low %v1415_v25, %v1419_v35  ;;  %v1431_v23 = vrot.slane %v5235_v49, %v4840_v51  ;;  %v3593_v47 = vpop.permute.xlu1 %3592 }
 0x2ad   : > { %v2661_v53 = vcombine.low %v1423_v18, %v1427_v31  ;;  %v2668_v13 = vrot.slane %v2658_v24, %v4867_v9  ;;  %v2675_v44 = vrot.slane %v2659_v36, %v4867_v9  ;;  %v1435_v37 = vrot.slane %v5235_v49, %v4843_v52  ;;  %v3590_v17 = vpop.permute.xlu0 %3589 }
 0x2ae   : > { %v2607_v21 = vrot.slane %v2593_v39, %v4867_v9  ;;  %v2682_v29 = vrot.slane %v2660_v42, %v4867_v9  ;;  %v1439_v45 = vrot.slane %v5235_v49, %v4847_v56  ;;  %v1443_v58 = vrot.slane %v5235_v49, %v4850_v60 }
 0x2af   : > { %v2689_v51 = vrot.slane %v2661_v53, %v4867_v9  ;;  %v2690_v11 = vcombine.low %v2668_v13, %v2675_v44  ;;  %v1447_v12 = vrot.slane %v5235_v49, %v4853_v61  ;;  %v1451_v5 = vrot.slane %v5235_v49, %v4857_v3 }
 0x2b0   : > { %v2608_v52 = vcombine.low %v2600_v40, %v2607_v21  ;;  %v1455_v46 = vrot.slane %v5235_v49, %v4860_v4  ;;  %v1459_v50 = vrot.slane %v5235_v49, %v4864_v8  ;;  %v2707_v56 = vcombine.low %v1431_v23, %v1435_v37  ;;  %v3551_v14 = vpop.permute.xlu1 %3550 }
 0x2b1   : > { %v2691_v55 = vcombine.low %v2682_v29, %v2689_v51  ;;  %v2698_v60 = vrot.slane %v2690_v11, %v4867_v9  ;;  %v2708_v48 = vcombine.low %v1439_v45, %v1443_v58  ;;  %v2709_v1 = vcombine.low %v1447_v12, %v1451_v5  ;;  %v3596_v0 = vpop.permute.xlu0 %3595 }
 0x2b2   : > { %3577 = vperm.xlu1 %4221, %v2608_v52   ;;  %v2710_v59 = vcombine.low %v1455_v46, %v1459_v50  ;;  %v2717_v61 = vrot.slane %v2707_v56, %v4867_v9  ;;  %v5664_v33 = vand.u32 127, %v948_v27 }
 0x2b3   : > { %v2705_v10 = vrot.slane %v2691_v55, %v4867_v9  ;;  %v2724_v3 = vrot.slane %v2708_v48, %v4867_v9  ;;  %v2731_v41 = vrot.slane %v2709_v1, %v4867_v9 }
 0x2b4   : > { %v2738_v4 = vrot.slane %v2710_v59, %v4867_v9  ;;  %v5641_v43 = vpop.permute.xlu1 %3598  ;;  %v3642_v31 = vadd.s32 4294967288, %v5664_v33  ;;  %v3649_v24 = vadd.s32 4294967280, %v5664_v33  ;;  %v3640_v36 = vsub.s32 %v5664_v33, %v4835_v38 }
 0x2b5   : > { %v2706_v62 = vcombine.low %v2698_v60, %v2705_v10  ;;  %v2739_v8 = vcombine.low %v2717_v61, %v2724_v3  ;;  %v3656_v40 = vadd.s32 4294967272, %v5664_v33  ;;  %v3663_v23 = vadd.s32 4294967264, %v5664_v33 }
 0x2b6   : > { %v2740_v49 = vcombine.low %v2731_v41, %v2738_v4  ;;  %v3645_v39 = vsub.s32 %v3642_v31, %v4835_v38  ;;  %v3652_v42 = vsub.s32 %v3649_v24, %v4835_v38  ;;  %v3641_v44 = vrot.slane %v3542_v34, %v3640_v36 }
 0x2b7   : > { %3583 = vperm.xlu1 %4221, %v2706_v62   ;;  %v2747_v2 = vrot.slane %v2739_v8, %v4867_v9  ;;  %v3750_v37 = vrot.slane %v3590_v17, %v3640_v36  ;;  %v3670_v21 = vadd.s32 4294967256, %v5664_v33  ;;  %v3677_v45 = vadd.s32 4294967248, %v5664_v33 }
 0x2b8   : > { %v2754_v6 = vrot.slane %v2740_v49, %v4867_v9  ;;  %v3548_v15 = vpop.permute.xlu1 %3547  ;;  %v3646_v58 = vrot.slane %v3545_v63, %v3645_v39  ;;  %v3754_v51 = vrot.slane %v3593_v47, %v3645_v39  ;;  %v3659_v11 = vsub.s32 %v3656_v40, %v4835_v38 }
 0x2b9   : > { %v3653_v29 = vrot.slane %v3548_v15, %v3652_v42  ;;  %v3759_v12 = vrot.slane %v3596_v0, %v3652_v42  ;;  %v3666_v5 = vsub.s32 %v3663_v23, %v4835_v38  ;;  %v3673_v50 = vsub.s32 %v3670_v21, %v4835_v38 }
 0x2ba   : > { %v2755_v22 = vcombine.low %v2747_v2, %v2754_v6  ;;  %v3648_v52 = vsel %vm3647_vm0, %v3646_v58, %v3641_v44  ;;  %v3755_v46 = vsel %vm3647_vm0, %v3754_v51, %v3750_v37  ;;  %v3684_v56 = vadd.s32 4294967240, %v5664_v33 }
 0x2bb   : > { %v3655_v55 = vsel %vm3654_vm1, %v3653_v29, %v3648_v52  ;;  %v3680_v48 = vsub.s32 %v3677_v45, %v4835_v38  ;;  %v3691_v1 = vadd.s32 4294967232, %v5664_v33  ;;  %v3660_v10 = vrot.slane %v3551_v14, %v3659_v11 }
 0x2bc   : > { %3586 = vperm.xlu1 %4221, %v2755_v22   ;;  %v3764_v3 = vrot.slane %v5641_v43, %v3659_v11  ;;  %v3760_v41 = vsel %vm3654_vm1, %v3759_v12, %v3755_v46  ;;  %v3698_v62 = vadd.s32 4294967224, %v5664_v33  ;;  %v3687_v2 = vsub.s32 %v3684_v56, %v4835_v38 }
 0x2bd   : > { %v5649_v19 = vpop.permute.xlu0 %3601  ;;  %v3662_v49 = vsel %vm3661_vm2, %v3660_v10, %v3655_v55  ;;  %v3705_v6 = vadd.s32 4294967216, %v5664_v33  ;;  %v3694_v47 = vsub.s32 %v3691_v1, %v4835_v38  ;;  %v3726_v12 = vadd.s32 4294967192, %v5664_v33 }
 0x2be   : > { %v3769_v4 = vrot.slane %v5649_v19, %v3666_v5  ;;  %v3765_v15 = vsel %vm3661_vm2, %v3764_v3, %v3760_v41  ;;  %v3701_v17 = vsub.s32 %v3698_v62, %v4835_v38 }
 0x2c2   : > { %v5643_v54 = vpop.permute.xlu1 %3556 }
 0x2c3   : > { %v3674_v43 = vrot.slane %v5643_v54, %v3673_v50  ;;  %v3719_v54 = vadd.s32 4294967200, %v5664_v33 }
 0x2c5   : > { %v3722_v21 = vsub.s32 %v3719_v54, %v4835_v38 }
 0x2c9   : > { %v5645_v16 = vpop.permute.xlu1 %3604 }
 0x2ca   : > { %v3774_v8 = vrot.slane %v5645_v16, %v3673_v50  ;;  %v3770_v16 = vsel %vm3668_vm3, %v3769_v4, %v3765_v15 }
 0x2ce   : > { %v5651_v57 = vpop.permute.xlu0 %3607 }
 0x2cf   : > { %v3779_v63 = vrot.slane %v5651_v57, %v3680_v48  ;;  %v3775_v57 = vsel %vm3675_vm4, %v3774_v8, %v3770_v16 }
 0x2d1   : > { %v3780_v24 = vsel %vm3682_vm5, %v3779_v63, %v3775_v57 }
 0x2d3   : > { %v3554_v26 = vpop.permute.xlu1 %3553 }
 0x2d4   : > { %v3667_v60 = vrot.slane %v3554_v26, %v3666_v5  ;;  %v3712_v26 = vadd.s32 4294967208, %v5664_v33  ;;  %v3740_v5 = vadd.s32 4294967176, %v5664_v33 }
 0x2d6   : > { %v3669_v22 = vsel %vm3668_vm3, %v3667_v60, %v3662_v49  ;;  %v3715_v44 = vsub.s32 %v3712_v26, %v4835_v38  ;;  %v3729_v60 = vsub.s32 %v3726_v12, %v4835_v38 }
 0x2d7   : > { %v3676_v31 = vsel %vm3675_vm4, %v3674_v43, %v3669_v22 }
 0x2d9   : > { %v5647_v32 = vpop.permute.xlu1 %3562 }
 0x2da   : > { %v3688_v40 = vrot.slane %v5647_v32, %v3687_v2 }
 0x2de   : > { %v5655_v20 = vpop.permute.xlu0 %3568 }
 0x2e3   : > { %v5653_v7 = vpop.permute.xlu1 %3610 }
 0x2e4   : > { %v3784_v34 = vrot.slane %v5653_v7, %v3687_v2 }
 0x2e6   : > { %v3785_v42 = vsel %vm3689_vm6, %v3784_v34, %v3780_v24 }
 0x2e8   : > { %v5659_v28 = vpop.permute.xlu0 %3613 }
 0x2e9   : > { %v3789_v7 = vrot.slane %v5659_v28, %v3694_v47  ;;  %v3733_v28 = vadd.s32 4294967184, %v5664_v33  ;;  %v3743_v33 = vsub.s32 %v3740_v5, %v4835_v38 }
 0x2eb   : > { %v3790_v29 = vsel %vm3696_vm7, %v3789_v7, %v3785_v42  ;;  %v3736_v46 = vsub.s32 %v3733_v28, %v4835_v38 }
 0x2ee   : > { %v5657_v25 = vpop.permute.xlu1 %3559 }
 0x2ef   : > { %v3681_v14 = vrot.slane %v5657_v25, %v3680_v48  ;;  %v3708_v25 = vsub.s32 %v3705_v6, %v4835_v38 }
 0x2f1   : > { %v3683_v36 = vsel %vm3682_vm5, %v3681_v14, %v3676_v31 }
 0x2f2   : > { %v3690_v37 = vsel %vm3689_vm6, %v3688_v40, %v3683_v36 }
 0x2f3   : > { %v5666_v35 = vpop.permute.xlu0 %3622 }
 0x2f8   : > { %v5661_v30 = vpop.permute.xlu1 %3616 }
 0x2f9   : > { %v3794_v23 = vrot.slane %v5661_v30, %v3701_v17  ;;  %v3702_v30 = vrot.slane %v5655_v20, %v3701_v17  ;;  %v3804_v20 = vrot.slane %v5666_v35, %v3715_v44 }
 0x2fb   : > { %v3795_v11 = vsel %vm3703_vm8, %v3794_v23, %v3790_v29 }
 0x2fd   : > { %v5678_v53 = vpop.permute.xlu0 %3619 }
 0x303   : > { %v5690_v59 = vpop.permute.xlu0 %3628 }
 0x304   : > { %v3814_v8 = vrot.slane %v5690_v59, %v3729_v60 }
 0x308   : > { %v5668_v18 = vpop.permute.xlu1 %3565 }
 0x309   : > { %v3695_v39 = vrot.slane %v5668_v18, %v3694_v47  ;;  %v3799_v18 = vrot.slane %v5678_v53, %v3708_v25 }
 0x30b   : > { %v3697_v45 = vsel %vm3696_vm7, %v3695_v39, %v3690_v37  ;;  %v3800_v53 = vsel %vm3710_vm9, %v3799_v18, %v3795_v11 }
 0x30c   : > { %v3704_v52 = vsel %vm3703_vm8, %v3702_v30, %v3697_v45  ;;  %v3805_v10 = vsel %vm3717_vm10, %v3804_v20, %v3800_v53 }
 0x30d   : > { %v3626_v0 = vpop.permute.xlu0 %3625 }
 0x30e   : > { %v3809_v50 = vrot.slane %v3626_v0, %v3722_v21 }
 0x310   : > { %v3810_v41 = vsel %vm3724_vm11, %v3809_v50, %v3805_v10 }
 0x311   : > { %v3815_v2 = vsel %vm3731_vm12, %v3814_v8, %v3810_v41 }
 0x312   : > { %v5680_v13 = vpop.permute.xlu1 %3574 }
 0x313   : > { %v3716_v48 = vrot.slane %v5680_v13, %v3715_v44 }
 0x318   : > { %v3632_v58 = vpop.permute.xlu0 %3631 }
 0x319   : > { %v3819_v4 = vrot.slane %v3632_v58, %v3736_v46 }
 0x31b   : > { %v3820_v63 = vsel %vm3738_vm13, %v3819_v4, %v3815_v2 }
 0x31d   : > { %v5692_v61 = vpop.permute.xlu1 %3571 }
 0x31e   : > { %v3709_v32 = vrot.slane %v5692_v61, %v3708_v25 }
 0x320   : > { %v3711_v56 = vsel %vm3710_vm9, %v3709_v32, %v3704_v52 }
 0x321   : > { %v3718_v3 = vsel %vm3717_vm10, %v3716_v48, %v3711_v56 }
 0x322   : > { %v3635_v61 = vpop.permute.xlu0 %3634 }
 0x323   : > { %v3824_v49 = vrot.slane %v3635_v61, %v3743_v33 }
 0x325   : > { %v3825_v14 = vsel %vm3745_vm14, %v3824_v49, %v3820_v63 }
 0x327   : > { %v3581_v19 = vpop.permute.xlu1 %3580 }
 0x328   : > { %v3730_v13 = vrot.slane %v3581_v19, %v3729_v60 }
 0x32d   : > { %v3578_v51 = vpop.permute.xlu1 %3577 }
 0x32e   : > { %v3723_v55 = vrot.slane %v3578_v51, %v3722_v21 }
 0x330   : > { %v3725_v62 = vsel %vm3724_vm11, %v3723_v55, %v3718_v3 }
 0x331   : > { %v3732_v6 = vsel %vm3731_vm12, %v3730_v13, %v3725_v62 }
 0x332   : > { %v3584_v1 = vpop.permute.xlu1 %3583 }
 0x333   : > { %v3737_v35 = vrot.slane %v3584_v1, %v3736_v46 }
 0x335   : > { %v3739_v47 = vsel %vm3738_vm13, %v3737_v35, %v3732_v6 }
 0x337   : > { %v3587_v38 = vpop.permute.xlu1 %3586 }
 0x338   : > { %v3744_v22 = vrot.slane %v3587_v38, %v3743_v33 }
 0x33a   : > { %v3746_v43 = vsel %vm3745_vm14, %v3744_v22, %v3739_v47 }
 0x33b   : > { %v3826_v15 = vcombine.low %v3746_v43, %v3825_v14 }
 0x33d   : > { %v3833_v34 = vrot.slane %v3826_v15, %v4867_v9  ;;  %3854 = sbr.rel (!%p5808_p4) target bundleno = 860 (0x35c), region = 52 }
 0x33f   : > { %v3840_v59 = vrot.slane %v3833_v34, %v4867_v9 }
 0x341   : > { %3846 = vst.msk [vmem:[%s264_s19] sm:$0x3] %vm3844_vm15, %v3840_v59 }
 0x342   : > { %s5818_s29 = smov (!%p3857_p13, %s3856_s29), 2 }
 0x343   : > { %s5749_s10 = sshll.u32 %s5818_s29, 4 }
 0x344   : > { %s3861_s11 = ssub.s32 32, %s5749_s10 }
 0x345   : > { %3862 = vsyncadd %s3848_s26, %s3861_s11  ;;  %p3999_p5 = scmp.ne.s32.totalorder %s5749_s10, 0  ;;  %s4004_s14 = sshll.u32 %s4600_s4, 5 }
 0x346   : > { %s3865_s17 = scalar_lea.hbm %s5799_s5, %s4004_s14  ;;  %s3867_s18 = sshll.u32 %s264_s19, 4  ;;  %s3868_s18 = int_to_ptr.vmem [resolvable:$true] %s3867_s18 }
 0x347   : > { %s4467_s30 = scalar_lea.vmem %s3868_s18, %s5749_s10  ;;  %s4545_s8 = smov [#allocation8]  }
 0x348   : > { %p4468_p1 = scmp.ne.s32.totalorder %s3868_s18, %s4467_s30  ;;  %s4471_s24 = sshll.u32 %s4545_s8, 4  ;;  %s4472_s24 = int_to_ptr.vmem [resolvable:$false] %s4471_s24 }
 0x349   : > { %s4473_s27 = scalar_lea.vmem %s4472_s24, 64  ;;  %p4474_p3 = scmp.lt.s32.totalorder %s3868_s18, %s4472_s24 }
 0x34a   : > { %p4469_p0 = pnand %p4468_p1, %p3999_p5  ;;  %p4475_p8 = scmp.lt.s32.totalorder %s4473_s27, %s4467_s30 }
 0x34c   : > { %p4470_p7 = pneg %p4469_p0  ;;  %p4476_p9 = por %p4475_p8, %p4474_p3 }
 0x34e   : > { %p4477_p6 = pnand %p4476_p9, %p4470_p7 }
 0x350   : > { %4480 = shalt.err (!%p4477_p6)
}
 0x351   : > { %s4481_s4 = scalar_lea.hbm %s3865_s17, %s5749_s10  ;;  %s4485_s19 = scalar_lea.hbm %s5799_s5, 48 }
 0x352   : > { %p4482_p11 = scmp.ne.s32.totalorder %s3865_s17, %s4481_s4  ;;  %p4486_p10 = scmp.lt.s32.totalorder %s3865_s17, %s5799_s5 }
 0x353   : > { %p4487_p4 = scmp.lt.s32.totalorder %s4485_s19, %s4481_s4 }
 0x354   : > { %p4483_p12 = pnand %p4482_p11, %p3999_p5 }
 0x355   : > { %p4488_p13 = por %p4487_p4, %p4486_p10 }
 0x356   : > { %p4484_p2 = pneg %p4483_p12 }
 0x358   : > { %p4489_p1 = pnand %p4488_p13, %p4484_p2 }
 0x35a   : > { %4492 = shalt.err (!%p4489_p1)
}
 0x35b   : > { %3870 = dma.vmem_to_hbm [thread:$0]  (%p3999_p5), %s3868_s18, %s5749_s10, %s3865_s17, %s3848_s26  }
 0x35c PF: > { %s3879_s11 = sand.u32 1, %s4523_s20   ;;  %p5809_p0 = scmp.ne.s32.totalorder %s5805_s7, 0 }
 0x35d   : > { %p5810_p7 = scmp.ge.s32.totalorder %s4535_s23, 2  ;;  %s3880_s14 = scalar_lea.sflag [#allocation5], %s3879_s11 }
 0x35f   : > { %p4176_p3 = pnand %p5810_p7, %p5809_p0 }
 0x361   : > { %p4177_p8 = pneg %p4176_p3 }
 0x363   : > { %4518 = dma.done.wait (%p4177_p8), %s3880_s14, 32  }
 0x364   : > { %4520 = vsyncadd (%p4177_p8), %s3880_s14, 4294967264  ;;  %p20_p9 = scmp.ge.s32.totalorder %s4604_s25, 4   ;;  %s5811_s20 = smov %s4527_s21 }
 0x365   : > { %s5812_s21 = smov %s4531_s22  ;;  %s5813_s22 = smov %s4616_s28 }
 0x366   : > { %s5814_s23 = smov %s4604_s25  ;;  %22 = sbr.rel (!%p20_p9) target bundleno = 8 (0x8), region = 89 }
 0x36b   :  { %3885 = vsyncpa [#allocation4], 1 }
 0x36c   :  { %3887 = vsyncpa [#allocation4 + $0x1], 1 }
 0x36d   :  { %3888 = vsyncpa [#allocation7], 1 }
 0x36e   :  { %3889 = vsyncpa [#allocation5], 1 }
 0x36f   :  { %3891 = vsyncpa [#allocation5 + $0x1], 1 }

</bundles_post_ra>
